<compile_context>
chip_gen: v7x
topology: tpu7x:2x2x1
jax: 0.10.0
libtpu: 0.0.40
codegen_flags: <defaults>
</compile_context>

<pallas_src>
import jax
import jax.numpy as jnp
from jax.experimental import pallas as pl
from jax.experimental.pallas import tpu as pltpu

_LOGICAL_DIMS = (784, 520, 320, 240, 120, 10)
# K unpadded (784); hidden dims lane-aligned; logits padded to a dense 128 lanes.
_PADDED_DIMS = (784, 640, 384, 256, 128, 128)
_NEG_FILL = -1e9   # pad value for b5's extra logit columns


def _round_up(n, m):
    return ((n + m - 1) // m) * m


# ----------------------------- Pallas kernel ------------------------------


def _mlp_kernel(x_ref,
                w1_ref, b1_ref, w2_ref, b2_ref, w3_ref, b3_ref,
                w4_ref, b4_ref, w5_ref, b5_ref,
                o_ref):
    """One batch tile: 4x (bf16 matmul -> f32 acc -> bias + ReLU), final
    matmul + bias (padded logit columns sit at ~-1e9), stable log_softmax."""

    def linear(h, w_ref, b_ref):
        # bf16 into the MXU, f32 accumulation; bias added on the f32 result.
        lhs = h if h.dtype == jnp.bfloat16 else h.astype(jnp.bfloat16)
        y = jnp.dot(lhs, w_ref[...], preferred_element_type=jnp.float32)
        return y + b_ref[...]

    h = x_ref[...]                                    # (TB, 784) bf16
    h = jnp.maximum(linear(h, w1_ref, b1_ref), 0.0)   # (TB, 640) f32
    h = jnp.maximum(linear(h, w2_ref, b2_ref), 0.0)   # (TB, 384)
    h = jnp.maximum(linear(h, w3_ref, b3_ref), 0.0)   # (TB, 256)
    h = jnp.maximum(linear(h, w4_ref, b4_ref), 0.0)   # (TB, 128)
    logits = linear(h, w5_ref, b5_ref)                # (TB, 128); cols 10.. ~= -1e9

    # log_softmax(x) = (x - max) - log(sum(exp(x - max)))
    # Padded columns (~-1e9) never win the max and exp-underflow to 0.
    m = jnp.max(logits, axis=-1, keepdims=True)
    shifted = logits - m
    lse = jnp.log(jnp.sum(jnp.exp(shifted), axis=-1, keepdims=True))
    o_ref[...] = (shifted - lse).astype(o_ref.dtype)


# ------------------------------ wrapper -----------------------------------


@jax.jit
def simple_net_forward(x, packed_params):
    """x: any shape with 784 elements per row (e.g. (B, 1, 28, 28)).
    packed_params: output of pack_params() — padded bf16 weights, f32 biases."""
    x2d = x.reshape(-1, _LOGICAL_DIMS[0]).astype(jnp.bfloat16)   # stream x in bf16
    batch = x2d.shape[0]
    k_in = _PADDED_DIMS[0]
    n_out = _PADDED_DIMS[-1]

    # Batch tile: single 16-row tile for tiny batches; otherwise split into at
    # least 2 tiles (megacore sharding on v7x), capped at 512 rows/tile.
    if batch <= 16:
        tb = _round_up(max(batch, 1), 16)
    else:
        tb = min(512, _round_up((batch + 1) // 2, 16))
    b_pad = _round_up(batch, tb)

    # Only the batch axis is padded (no-op when batch % tb == 0).
    x_p = jnp.pad(x2d, ((0, b_pad - batch), (0, 0)))

    grid = (b_pad // tb,)
    in_specs = [pl.BlockSpec((tb, k_in), lambda i: (i, 0))]
    for p in packed_params:
        # Full-array blocks with a constant index_map: weights/biases stay
        # resident in VMEM and are reused across every batch tile.
        in_specs.append(pl.BlockSpec(p.shape, lambda i: (0, 0)))
    out_spec = pl.BlockSpec((tb, n_out), lambda i: (i, 0))

    flops = 2 * b_pad * sum(a * b for a, b in
                            zip(_PADDED_DIMS[:-1], _PADDED_DIMS[1:]))
    param_bytes = sum(p.size * p.dtype.itemsize for p in packed_params)
    bytes_accessed = param_bytes + b_pad * (k_in * 2 + n_out * 4)
    cost = pl.CostEstimate(flops=flops,
                           transcendentals=2 * b_pad * n_out,
                           bytes_accessed=bytes_accessed)

    out = pl.pallas_call(
        _mlp_kernel,
        out_shape=jax.ShapeDtypeStruct((b_pad, n_out), jnp.float32),
        grid=grid,
        in_specs=in_specs,
        out_specs=out_spec,
        compiler_params=pltpu.CompilerParams(
            dimension_semantics=("parallel",)),
        cost_estimate=cost,
    )(x_p, *packed_params)
    return out[:batch, :_LOGICAL_DIMS[-1]]


def init_params(key):
    """nn.Linear-style init: U(-1/sqrt(fan_in), +1/sqrt(fan_in)); w is (in, out)."""
    params = []
    for i in range(len(_LOGICAL_DIMS) - 1):
        fan_in, fan_out = _LOGICAL_DIMS[i], _LOGICAL_DIMS[i + 1]
        key, kw, kb = jax.random.split(key, 3)
        bound = 1.0 / (fan_in ** 0.5)
        w = jax.random.uniform(kw, (fan_in, fan_out), jnp.float32, -bound, bound)
        b = jax.random.uniform(kb, (1, fan_out), jnp.float32, -bound, bound)
        params += [w, b]
    return tuple(params)


def pack_params(params):
    """Zero-pad weights to the lane-aligned dims, quantize weights to bf16.
    Biases are zero-padded except the final layer, whose padded logit columns
    are filled with -1e9 so log_softmax never sees them as real classes."""
    packed = []
    n_layers = len(_LOGICAL_DIMS) - 1
    for i in range(n_layers):
        w, b = params[2 * i], params[2 * i + 1]
        kin, kout = _PADDED_DIMS[i], _PADDED_DIMS[i + 1]
        wp = jnp.pad(w.astype(jnp.bfloat16),
                     ((0, kin - w.shape[0]), (0, kout - w.shape[1])))
        pad_val = _NEG_FILL if i == n_layers - 1 else 0.0
        bp = jnp.pad(b, ((0, 0), (0, kout - b.shape[1])),
                     constant_values=pad_val)
        packed += [wp, bp]
    return tuple(packed)


def reference_forward(x, params):
    """Pure-JAX reference applying the same bf16 quantization of weights and
    matmul inputs as the kernel (f32 accumulation), so tolerances stay tight."""
    def q(v):
        return v.astype(jnp.bfloat16).astype(jnp.float32)

    h = x.reshape(-1, 784).astype(jnp.float32)
    for i in range(4):
        w, b = params[2 * i], params[2 * i + 1]
        h = jnp.maximum(
            jnp.dot(q(h), q(w), preferred_element_type=jnp.float32) + b, 0.0)
    logits = jnp.dot(q(h), q(params[8]),
                     preferred_element_type=jnp.float32) + params[9]
    return jax.nn.log_softmax(logits, axis=1)


# -------------------------------- main -------------------------------------

if __name__ == "__main__":
    key = jax.random.PRNGKey(0)
    kx, kp = jax.random.split(key)

    # MNIST-like input: (batch, 1, 28, 28) -> flattened to (batch, 784) inside.
    batch = 8
    x = jax.random.normal(kx, (batch, 1, 28, 28), dtype=jnp.float32)

    params = init_params(kp)
    packed = pack_params(params)

    out = jax.block_until_ready(simple_net_forward(x, packed))
    ref = reference_forward(x, params)

    assert out.shape == (batch, 10), out.shape
    assert jnp.allclose(out, ref, atol=2e-2, rtol=2e-2), "mismatch vs JAX reference"
    # log_softmax rows should exp-sum to ~1 over the 10 real classes.
    assert jnp.allclose(jnp.sum(jnp.exp(out), axis=1), 1.0, atol=1e-4)

    print("KERNEL_OK")
</pallas_src>

<mosaic_0001>
module attributes {stable_mosaic.version = 11 : i64} {
  func.func @_mlp_kernel(%arg0: i32, %arg1: memref<16x784xbf16, #tpu.memory_space<vmem>>, %arg2: memref<784x640xbf16, #tpu.memory_space<vmem>>, %arg3: memref<1x640xf32, #tpu.memory_space<vmem>>, %arg4: memref<640x384xbf16, #tpu.memory_space<vmem>>, %arg5: memref<1x384xf32, #tpu.memory_space<vmem>>, %arg6: memref<384x256xbf16, #tpu.memory_space<vmem>>, %arg7: memref<1x256xf32, #tpu.memory_space<vmem>>, %arg8: memref<256x128xbf16, #tpu.memory_space<vmem>>, %arg9: memref<1x128xf32, #tpu.memory_space<vmem>>, %arg10: memref<128x128xbf16, #tpu.memory_space<vmem>>, %arg11: memref<1x128xf32, #tpu.memory_space<vmem>>, %arg12: memref<16x128xf32, #tpu.memory_space<vmem>>) attributes {dimension_semantics = [#tpu.dimension_semantics<parallel>], iteration_bounds = array<i64: 1>, scalar_prefetch = 0 : i64, scratch_operands = 0 : i64, tpu.core_type = #tpu.core_type<tc>, window_params = [{transform_indices = @transform_0, window_bounds = array<i64: 16, 784>}, {pipeline_mode = #tpu.pipeline_mode<synchronous>, transform_indices = @transform_1, window_bounds = array<i64: 784, 640>}, {pipeline_mode = #tpu.pipeline_mode<synchronous>, transform_indices = @transform_2, window_bounds = array<i64: 1, 640>}, {pipeline_mode = #tpu.pipeline_mode<synchronous>, transform_indices = @transform_3, window_bounds = array<i64: 640, 384>}, {pipeline_mode = #tpu.pipeline_mode<synchronous>, transform_indices = @transform_4, window_bounds = array<i64: 1, 384>}, {pipeline_mode = #tpu.pipeline_mode<synchronous>, transform_indices = @transform_5, window_bounds = array<i64: 384, 256>}, {pipeline_mode = #tpu.pipeline_mode<synchronous>, transform_indices = @transform_6, window_bounds = array<i64: 1, 256>}, {pipeline_mode = #tpu.pipeline_mode<synchronous>, transform_indices = @transform_7, window_bounds = array<i64: 256, 128>}, {pipeline_mode = #tpu.pipeline_mode<synchronous>, transform_indices = @transform_8, window_bounds = array<i64: 1, 128>}, {pipeline_mode = #tpu.pipeline_mode<synchronous>, transform_indices = @transform_9, window_bounds = array<i64: 128, 128>}, {pipeline_mode = #tpu.pipeline_mode<synchronous>, transform_indices = @transform_10, window_bounds = array<i64: 1, 128>}, {transform_indices = @transform_11, window_bounds = array<i64: 16, 128>}]} {
    %c0 = arith.constant 0 : index
    %c0_0 = arith.constant 0 : index
    %0 = vector.load %arg1[%c0, %c0_0] : memref<16x784xbf16, #tpu.memory_space<vmem>>, vector<16x784xbf16>
    %c0_1 = arith.constant 0 : index
    %c0_2 = arith.constant 0 : index
    %1 = vector.load %arg2[%c0_1, %c0_2] : memref<784x640xbf16, #tpu.memory_space<vmem>>, vector<784x640xbf16>
    %cst = arith.constant dense<0.000000e+00> : vector<16x640xf32>
    %2 = tpu.matmul %0, %1, %cst {dimension_numbers = #tpu.dot_dimension_numbers<[1], [0], [0], [1], [0, 0, 1, 1], [], []>} : vector<16x784xbf16>, vector<784x640xbf16>, vector<16x640xf32> -> vector<16x640xf32>
    %c0_3 = arith.constant 0 : index
    %c0_4 = arith.constant 0 : index
    %3 = vector.load %arg3[%c0_3, %c0_4] : memref<1x640xf32, #tpu.memory_space<vmem>>, vector<1x640xf32>
    %4 = vector.broadcast %3 : vector<1x640xf32> to vector<16x640xf32>
    %5 = arith.addf %2, %4 : vector<16x640xf32>
    %cst_5 = arith.constant 0.000000e+00 : f32
    %6 = vector.broadcast %cst_5 : f32 to vector<16x640xf32>
    %7 = arith.maximumf %5, %6 : vector<16x640xf32>
    %8 = arith.truncf %7 : vector<16x640xf32> to vector<16x640xbf16>
    %c0_6 = arith.constant 0 : index
    %c0_7 = arith.constant 0 : index
    %9 = vector.load %arg4[%c0_6, %c0_7] : memref<640x384xbf16, #tpu.memory_space<vmem>>, vector<640x384xbf16>
    %cst_8 = arith.constant dense<0.000000e+00> : vector<16x384xf32>
    %10 = tpu.matmul %8, %9, %cst_8 {dimension_numbers = #tpu.dot_dimension_numbers<[1], [0], [0], [1], [0, 0, 1, 1], [], []>} : vector<16x640xbf16>, vector<640x384xbf16>, vector<16x384xf32> -> vector<16x384xf32>
    %c0_9 = arith.constant 0 : index
    %c0_10 = arith.constant 0 : index
    %11 = vector.load %arg5[%c0_9, %c0_10] : memref<1x384xf32, #tpu.memory_space<vmem>>, vector<1x384xf32>
    %12 = vector.broadcast %11 : vector<1x384xf32> to vector<16x384xf32>
    %13 = arith.addf %10, %12 : vector<16x384xf32>
    %cst_11 = arith.constant 0.000000e+00 : f32
    %14 = vector.broadcast %cst_11 : f32 to vector<16x384xf32>
    %15 = arith.maximumf %13, %14 : vector<16x384xf32>
    %16 = arith.truncf %15 : vector<16x384xf32> to vector<16x384xbf16>
    %c0_12 = arith.constant 0 : index
    %c0_13 = arith.constant 0 : index
    %17 = vector.load %arg6[%c0_12, %c0_13] : memref<384x256xbf16, #tpu.memory_space<vmem>>, vector<384x256xbf16>
    %cst_14 = arith.constant dense<0.000000e+00> : vector<16x256xf32>
    %18 = tpu.matmul %16, %17, %cst_14 {dimension_numbers = #tpu.dot_dimension_numbers<[1], [0], [0], [1], [0, 0, 1, 1], [], []>} : vector<16x384xbf16>, vector<384x256xbf16>, vector<16x256xf32> -> vector<16x256xf32>
    %c0_15 = arith.constant 0 : index
    %c0_16 = arith.constant 0 : index
    %19 = vector.load %arg7[%c0_15, %c0_16] : memref<1x256xf32, #tpu.memory_space<vmem>>, vector<1x256xf32>
    %20 = vector.broadcast %19 : vector<1x256xf32> to vector<16x256xf32>
    %21 = arith.addf %18, %20 : vector<16x256xf32>
    %cst_17 = arith.constant 0.000000e+00 : f32
    %22 = vector.broadcast %cst_17 : f32 to vector<16x256xf32>
    %23 = arith.maximumf %21, %22 : vector<16x256xf32>
    %24 = arith.truncf %23 : vector<16x256xf32> to vector<16x256xbf16>
    %c0_18 = arith.constant 0 : index
    %c0_19 = arith.constant 0 : index
    %25 = vector.load %arg8[%c0_18, %c0_19] : memref<256x128xbf16, #tpu.memory_space<vmem>>, vector<256x128xbf16>
    %cst_20 = arith.constant dense<0.000000e+00> : vector<16x128xf32>
    %26 = tpu.matmul %24, %25, %cst_20 {dimension_numbers = #tpu.dot_dimension_numbers<[1], [0], [0], [1], [0, 0, 1, 1], [], []>} : vector<16x256xbf16>, vector<256x128xbf16>, vector<16x128xf32> -> vector<16x128xf32>
    %c0_21 = arith.constant 0 : index
    %c0_22 = arith.constant 0 : index
    %27 = vector.load %arg9[%c0_21, %c0_22] : memref<1x128xf32, #tpu.memory_space<vmem>>, vector<1x128xf32>
    %28 = vector.broadcast %27 : vector<1x128xf32> to vector<16x128xf32>
    %29 = arith.addf %26, %28 : vector<16x128xf32>
    %cst_23 = arith.constant 0.000000e+00 : f32
    %30 = vector.broadcast %cst_23 : f32 to vector<16x128xf32>
    %31 = arith.maximumf %29, %30 : vector<16x128xf32>
    %32 = arith.truncf %31 : vector<16x128xf32> to vector<16x128xbf16>
    %c0_24 = arith.constant 0 : index
    %c0_25 = arith.constant 0 : index
    %33 = vector.load %arg10[%c0_24, %c0_25] : memref<128x128xbf16, #tpu.memory_space<vmem>>, vector<128x128xbf16>
    %cst_26 = arith.constant dense<0.000000e+00> : vector<16x128xf32>
    %34 = tpu.matmul %32, %33, %cst_26 {dimension_numbers = #tpu.dot_dimension_numbers<[1], [0], [0], [1], [0, 0, 1, 1], [], []>} : vector<16x128xbf16>, vector<128x128xbf16>, vector<16x128xf32> -> vector<16x128xf32>
    %c0_27 = arith.constant 0 : index
    %c0_28 = arith.constant 0 : index
    %35 = vector.load %arg11[%c0_27, %c0_28] : memref<1x128xf32, #tpu.memory_space<vmem>>, vector<1x128xf32>
    %36 = vector.broadcast %35 : vector<1x128xf32> to vector<16x128xf32>
    %37 = arith.addf %34, %36 : vector<16x128xf32>
    %cst_29 = arith.constant dense<0xFF800000> : vector<16xf32>
    %38 = vector.multi_reduction <maximumf>, %37, %cst_29 [1] : vector<16x128xf32> to vector<16xf32>
    %39 = vector.shape_cast %38 : vector<16xf32> to vector<16x1xf32>
    %40 = vector.broadcast %39 : vector<16x1xf32> to vector<16x128xf32>
    %41 = arith.subf %37, %40 : vector<16x128xf32>
    %42 = math.exp %41 : vector<16x128xf32>
    %cst_30 = arith.constant dense<0.000000e+00> : vector<16xf32>
    %43 = vector.multi_reduction <add>, %42, %cst_30 [1] : vector<16x128xf32> to vector<16xf32>
    %44 = vector.shape_cast %43 : vector<16xf32> to vector<16x1xf32>
    %45 = math.log %44 : vector<16x1xf32>
    %46 = vector.broadcast %45 : vector<16x1xf32> to vector<16x128xf32>
    %47 = arith.subf %41, %46 : vector<16x128xf32>
    %c0_31 = arith.constant 0 : index
    %c0_32 = arith.constant 0 : index
    %48 = vector.load %arg12[%c0_31, %c0_32] : memref<16x128xf32, #tpu.memory_space<vmem>>, vector<16x128xf32>
    tpu.vector_store %arg12[%c0_31, %c0_32], %47 {strides = array<i32>} : memref<16x128xf32, #tpu.memory_space<vmem>>, vector<16x128xf32>,
    return
  }
  func.func @transform_0(%arg0: i32) -> (i32, i32) {
    %c0_i32 = arith.constant 0 : i32
    %c0_i32_0 = arith.constant 0 : i32
    return %arg0, %c0_i32 : i32, i32
  }
  func.func @transform_1(%arg0: i32) -> (i32, i32) {
    %c0_i32 = arith.constant 0 : i32
    %c0_i32_0 = arith.constant 0 : i32
    %c0_i32_1 = arith.constant 0 : i32
    return %c0_i32, %c0_i32_0 : i32, i32
  }
  func.func @transform_2(%arg0: i32) -> (i32, i32) {
    %c0_i32 = arith.constant 0 : i32
    %c0_i32_0 = arith.constant 0 : i32
    %c0_i32_1 = arith.constant 0 : i32
    return %c0_i32, %c0_i32_0 : i32, i32
  }
  func.func @transform_3(%arg0: i32) -> (i32, i32) {
    %c0_i32 = arith.constant 0 : i32
    %c0_i32_0 = arith.constant 0 : i32
    %c0_i32_1 = arith.constant 0 : i32
    return %c0_i32, %c0_i32_0 : i32, i32
  }
  func.func @transform_4(%arg0: i32) -> (i32, i32) {
    %c0_i32 = arith.constant 0 : i32
    %c0_i32_0 = arith.constant 0 : i32
    %c0_i32_1 = arith.constant 0 : i32
    return %c0_i32, %c0_i32_0 : i32, i32
  }
  func.func @transform_5(%arg0: i32) -> (i32, i32) {
    %c0_i32 = arith.constant 0 : i32
    %c0_i32_0 = arith.constant 0 : i32
    %c0_i32_1 = arith.constant 0 : i32
    return %c0_i32, %c0_i32_0 : i32, i32
  }
  func.func @transform_6(%arg0: i32) -> (i32, i32) {
    %c0_i32 = arith.constant 0 : i32
    %c0_i32_0 = arith.constant 0 : i32
    %c0_i32_1 = arith.constant 0 : i32
    return %c0_i32, %c0_i32_0 : i32, i32
  }
  func.func @transform_7(%arg0: i32) -> (i32, i32) {
    %c0_i32 = arith.constant 0 : i32
    %c0_i32_0 = arith.constant 0 : i32
    %c0_i32_1 = arith.constant 0 : i32
    return %c0_i32, %c0_i32_0 : i32, i32
  }
  func.func @transform_8(%arg0: i32) -> (i32, i32) {
    %c0_i32 = arith.constant 0 : i32
    %c0_i32_0 = arith.constant 0 : i32
    %c0_i32_1 = arith.constant 0 : i32
    return %c0_i32, %c0_i32_0 : i32, i32
  }
  func.func @transform_9(%arg0: i32) -> (i32, i32) {
    %c0_i32 = arith.constant 0 : i32
    %c0_i32_0 = arith.constant 0 : i32
    %c0_i32_1 = arith.constant 0 : i32
    return %c0_i32, %c0_i32_0 : i32, i32
  }
  func.func @transform_10(%arg0: i32) -> (i32, i32) {
    %c0_i32 = arith.constant 0 : i32
    %c0_i32_0 = arith.constant 0 : i32
    %c0_i32_1 = arith.constant 0 : i32
    return %c0_i32, %c0_i32_0 : i32, i32
  }
  func.func @transform_11(%arg0: i32) -> (i32, i32) {
    %c0_i32 = arith.constant 0 : i32
    %c0_i32_0 = arith.constant 0 : i32
    return %arg0, %c0_i32 : i32, i32
  }
}

</mosaic_0001>

<bundles_post_ra>
// kernel: simple_net_forward.1
= control target key start
LH: loop header
LB: loop body
LE: loop exit
PB: predicated region body
PF: predicated region fallthrough
CT: control target
= control target key end

     0   :  { %16 = vsyncpa [#allocation3], 0  ;;  %s5852_s0 = inlined_call_operand.vmem [shape: bf16[16,784], index: 0, kind: input, shape index: {}]   ;;  %s5853_s1 = inlined_call_operand.hbm [shape: bf16[784,640], index: 1, kind: input, shape index: {}]   ;;  %s5854_s2 = inlined_call_operand.vmem [shape: f32[1,640], index: 2, kind: input, shape index: {}]   ;;  %s5855_s3 = inlined_call_operand.hbm [shape: bf16[640,384], index: 3, kind: input, shape index: {}]   ;;  %s5856_s4 = inlined_call_operand.vmem [shape: f32[1,384], index: 4, kind: input, shape index: {}]   ;;  %s5857_s5 = inlined_call_operand.vmem [shape: bf16[384,256], index: 5, kind: input, shape index: {}]   ;;  %s5858_s6 = inlined_call_operand.vmem [shape: f32[1,256], index: 6, kind: input, shape index: {}]   ;;  %s5859_s7 = inlined_call_operand.vmem [shape: bf16[256,128], index: 7, kind: input, shape index: {}]   ;;  %s5860_s8 = inlined_call_operand.vmem [shape: f32[1,128], index: 8, kind: input, shape index: {}]   ;;  %s5861_s9 = inlined_call_operand.vmem [shape: bf16[128,128], index: 9, kind: input, shape index: {}]   ;;  %s5862_s10 = inlined_call_operand.vmem [shape: f32[1,128], index: 10, kind: input, shape index: {}]   ;;  %s5863_s11 = inlined_call_operand.vmem [shape: f32[16,128], index: 11, kind: output, shape index: {}]  }
   0x1   :  { %17 = vsyncpa [#allocation5], 0  ;;  %s5396_s17 = smov [#allocation2]   ;;  %s5348_s21 = scalar_lea.hbm %s5853_s1, 31360 }
   0x2   :  { %s25_s18 = sshll.u32 %s5396_s17, 4  ;;  %p5349_p0 = scmp.ne.s32.totalorder %s5853_s1, %s5348_s21  ;;  %s26_s18 = int_to_ptr.vmem [resolvable:$true] %s25_s18 }
   0x3   :  { %p5352_p1 = scmp.lt.u32.totalorder %s5348_s21, %s5853_s1 }
   0x5   :  { %p5354_p2 = pnand %p5352_p1, %p5349_p0 }
   0x7   :  { %5357 = shalt.err (!%p5354_p2)
}
   0x8   :  { %s5358_s26 = scalar_lea.vmem %s26_s18, 31360  ;;  %p5363_p4 = scmp.lt.s32.totalorder %s26_s18, %s26_s18 }
   0x9   :  { %p5359_p3 = scmp.ne.s32.totalorder %s26_s18, %s5358_s26  ;;  %p5364_p5 = scmp.lt.s32.totalorder %s5358_s26, %s5358_s26 }
   0xb   :  { %p5365_p6 = por %p5364_p5, %p5363_p4 }
   0xd   :  { %p5366_p7 = pnand %p5365_p6, %p5359_p3 }
   0xf   :  { %5369 = shalt.err (!%p5366_p7)
}
  0x10   :  { %s5397_s27 = smov 320   ;;  %s5398_s28 = smov 20  }
  0x11   :  { %31 = dma.hbm_to_vmem [thread:$0]  %s5853_s1, 31360, %s26_s18, [#allocation3], %s5397_s27, %s5397_s27, %s5398_s28  }
  0x12   :  { %s5399_s12 = smov [#allocation4]   ;;  %s5370_s16 = scalar_lea.hbm %s5855_s3, 15360 }
  0x13   :  { %s39_s13 = sshll.u32 %s5399_s12, 4  ;;  %p5371_p8 = scmp.ne.s32.totalorder %s5855_s3, %s5370_s16  ;;  %s40_s13 = int_to_ptr.vmem [resolvable:$true] %s39_s13 }
  0x14   :  { %p5374_p9 = scmp.lt.u32.totalorder %s5370_s16, %s5855_s3 }
  0x16   :  { %p5376_p10 = pnand %p5374_p9, %p5371_p8 }
  0x18   :  { %5379 = shalt.err (!%p5376_p10)
}
  0x19   :  { %s5380_s22 = scalar_lea.vmem %s40_s13, 15360  ;;  %p5385_p12 = scmp.lt.s32.totalorder %s40_s13, %s40_s13 }
  0x1a   :  { %p5381_p11 = scmp.ne.s32.totalorder %s40_s13, %s5380_s22  ;;  %p5386_p13 = scmp.lt.s32.totalorder %s5380_s22, %s5380_s22 }
  0x1c   :  { %p5387_p0 = por %p5386_p13, %p5385_p12 }
  0x1e   :  { %p5388_p1 = pnand %p5387_p0, %p5381_p11 }
  0x20   :  { %5391 = shalt.err (!%p5388_p1)
}
  0x21   :  { %s5400_s1 = smov 192   ;;  %s5401_s18 = smov 12  }
  0x22   :  { %45 = dma.hbm_to_vmem [thread:$0]  %s5855_s3, 15360, %s40_s13, [#allocation5], %s5400_s1, %s5400_s1, %s5401_s18  }
  0x23   :  { %5392 = dma.done.wait [#allocation3], 31360  }
  0x24   :  { %5393 = vsyncadd [#allocation3], 4294935936 }
  0x25   :  { %5394 = dma.done.wait [#allocation5], 15360  }
  0x26   :  { %5395 = vsyncadd [#allocation5], 4294951936  ;;  %v4729_v0 = vld [vmem:[#allocation2 + $0x4] ss:$20 sps:$4 sm:$0xff]   ;;  %v4731_v1 = vld [vmem:[#allocation2 + $0xc] ss:$20 sps:$4 sm:$0xff]  }
  0x27   :  { %1709 = vmatprep.subr.bf16.mxu0 %v4729_v0  ;;  %v4733_v2 = vld [vmem:[#allocation2] ss:$20 sps:$4 sm:$0xff]   ;;  %v4734_v3 = vld [vmem:[#allocation2 + $0x8] ss:$20 sps:$4 sm:$0xff]   ;;  %1881 = vmatprep.subr.bf16.mxu1 %v4731_v1  ;;  %v4740_v7 = vld [vmem:[#allocation2 + $0x30] ss:$20 sps:$4 sm:$0xff]  }
  0x28   :  { %v4735_v4 = vld [vmem:[#allocation2 + $0x2c] ss:$20 sps:$4 sm:$0xff]   ;;  %1710 = vmatpush1.bf16.msra.mxu0 %v4733_v2  ;;  %1882 = vmatpush1.bf16.msra.mxu1 %v4734_v3  ;;  %v4737_v5 = vld [vmem:[#allocation2 + $0x34] ss:$20 sps:$4 sm:$0xff]   ;;  %v4743_v9 = vld [vmem:[#allocation2 + $0x5c] ss:$20 sps:$4 sm:$0xff]  }
  0x29   :  { %v4739_v6 = vld [vmem:[#allocation2 + $0x28] ss:$20 sps:$4 sm:$0xff]   ;;  %1711 = vmatprep.subr.bf16.mxu0 %v4735_v4  ;;  %1883 = vmatprep.subr.bf16.mxu1 %v4737_v5  ;;  %v4745_v10 = vld [vmem:[#allocation2 + $0x50] ss:$20 sps:$4 sm:$0xff]   ;;  %v4746_v11 = vld [vmem:[#allocation2 + $0x58] ss:$20 sps:$4 sm:$0xff]  }
  0x2a   :  { %v4741_v8 = vld [vmem:[#allocation2 + $0x54] ss:$20 sps:$4 sm:$0xff]   ;;  %v4747_v12 = vld [vmem:[#allocation2 + $0x7c] ss:$20 sps:$4 sm:$0xff]   ;;  %v4749_v13 = vld [vmem:[#allocation2 + $0x84] ss:$20 sps:$4 sm:$0xff]  }
  0x2b   :  { %v4751_v14 = vld [vmem:[#allocation2 + $0x78] ss:$20 sps:$4 sm:$0xff]   ;;  %v4752_v15 = vld [vmem:[#allocation2 + $0x80] ss:$20 sps:$4 sm:$0xff]   ;;  %v4758_v19 = vld [vmem:[#allocation2 + $0xa8] ss:$20 sps:$4 sm:$0xff]  }
  0x2c   :  { %1712 = vmatpush1.bf16.msra.mxu0 %v4739_v6  ;;  %1884 = vmatpush1.bf16.msra.mxu1 %v4740_v7  ;;  %v4753_v16 = vld [vmem:[#allocation2 + $0xa4] ss:$20 sps:$4 sm:$0xff]   ;;  %v4755_v17 = vld [vmem:[#allocation2 + $0xac] ss:$20 sps:$4 sm:$0xff]   ;;  %v4761_v21 = vld [vmem:[#allocation2 + $0xd4] ss:$20 sps:$4 sm:$0xff]  }
  0x2d   :  { %1713 = vmatprep.subr.bf16.mxu0 %v4741_v8  ;;  %1885 = vmatprep.subr.bf16.mxu1 %v4743_v9  ;;  %v4757_v18 = vld [vmem:[#allocation2 + $0xa0] ss:$20 sps:$4 sm:$0xff]   ;;  %v4763_v22 = vld [vmem:[#allocation2 + $0xc8] ss:$20 sps:$4 sm:$0xff]   ;;  %v4764_v23 = vld [vmem:[#allocation2 + $0xd0] ss:$20 sps:$4 sm:$0xff]  }
  0x2e   :  { %v4759_v20 = vld [vmem:[#allocation2 + $0xcc] ss:$20 sps:$4 sm:$0xff]   ;;  %v4765_v24 = vld [vmem:[#allocation2 + $0xf4] ss:$20 sps:$4 sm:$0xff]   ;;  %v4767_v25 = vld [vmem:[#allocation2 + $0xfc] ss:$20 sps:$4 sm:$0xff]  }
  0x2f   :  { %v4769_v26 = vld [vmem:[#allocation2 + $0xf0] ss:$20 sps:$4 sm:$0xff]   ;;  %v4770_v27 = vld [vmem:[#allocation2 + $0xf8] ss:$20 sps:$4 sm:$0xff]   ;;  %v4776_v31 = vld [vmem:[#allocation2 + $0x120] ss:$20 sps:$4 sm:$0xff]  }
  0x30   :  { %1714 = vmatpush1.bf16.msra.mxu0 %v4745_v10  ;;  %1886 = vmatpush1.bf16.msra.mxu1 %v4746_v11  ;;  %v4771_v28 = vld [vmem:[#allocation2 + $0x11c] ss:$20 sps:$4 sm:$0xff]   ;;  %v4773_v29 = vld [vmem:[#allocation2 + $0x124] ss:$20 sps:$4 sm:$0xff]   ;;  %v4779_v33 = vld [vmem:[#allocation2 + $0x14c] ss:$20 sps:$4 sm:$0xff]  }
  0x31   :  { %1715 = vmatprep.subr.bf16.mxu0 %v4747_v12  ;;  %1887 = vmatprep.subr.bf16.mxu1 %v4749_v13  ;;  %v4775_v30 = vld [vmem:[#allocation2 + $0x118] ss:$20 sps:$4 sm:$0xff]   ;;  %v4781_v34 = vld [vmem:[#allocation2 + $0x140] ss:$20 sps:$4 sm:$0xff]   ;;  %v4782_v35 = vld [vmem:[#allocation2 + $0x148] ss:$20 sps:$4 sm:$0xff]  }
  0x32   :  { %v4777_v32 = vld [vmem:[#allocation2 + $0x144] ss:$20 sps:$4 sm:$0xff]   ;;  %v4783_v36 = vld [vmem:[#allocation2 + $0x16c] ss:$20 sps:$4 sm:$0xff]   ;;  %v4785_v37 = vld [vmem:[#allocation2 + $0x174] ss:$20 sps:$4 sm:$0xff]  }
  0x33   :  { %v4787_v38 = vld [vmem:[#allocation2 + $0x168] ss:$20 sps:$4 sm:$0xff]   ;;  %v4788_v39 = vld [vmem:[#allocation2 + $0x170] ss:$20 sps:$4 sm:$0xff]   ;;  %v4794_v43 = vld [vmem:[#allocation2 + $0x198] ss:$20 sps:$4 sm:$0xff]  }
  0x34   :  { %1716 = vmatpush1.bf16.msra.mxu0 %v4751_v14  ;;  %1888 = vmatpush1.bf16.msra.mxu1 %v4752_v15  ;;  %v4789_v40 = vld [vmem:[#allocation2 + $0x194] ss:$20 sps:$4 sm:$0xff]   ;;  %v4791_v41 = vld [vmem:[#allocation2 + $0x19c] ss:$20 sps:$4 sm:$0xff]   ;;  %v4797_v45 = vld [vmem:[#allocation2 + $0x1c4] ss:$20 sps:$4 sm:$0xff]  }
  0x35   :  { %1717 = vmatprep.subr.bf16.mxu0 %v4753_v16  ;;  %1889 = vmatprep.subr.bf16.mxu1 %v4755_v17  ;;  %v4793_v42 = vld [vmem:[#allocation2 + $0x190] ss:$20 sps:$4 sm:$0xff]   ;;  %v4799_v46 = vld [vmem:[#allocation2 + $0x1b8] ss:$20 sps:$4 sm:$0xff]   ;;  %v4800_v48 = vld [vmem:[#allocation2 + $0x1c0] ss:$20 sps:$4 sm:$0xff]  }
  0x36   :  { %v4795_v44 = vld [vmem:[#allocation2 + $0x1bc] ss:$20 sps:$4 sm:$0xff]   ;;  %v4825_v47 = vld [vmem:[%s5852_s0 + $0x4] ss:$28 sps:$4 sm:$0xff]   ;;  %v4809_v54 = vld [vmem:[#allocation2 + $0x214] ss:$20 sps:$4 sm:$0xff]  }
  0x37   :  { %v4801_v49 = vld [vmem:[#allocation2 + $0x1e4] ss:$20 sps:$4 sm:$0xff]   ;;  %v4803_v50 = vld [vmem:[#allocation2 + $0x1ec] ss:$20 sps:$4 sm:$0xff]   ;;  %1741 = vmatprep.mubr.bf16.mxu0 %v4825_v47  ;;  %1913 = vmatprep.mubr.bf16.mxu1 %v4825_v47  ;;  %v4806_v52 = vld [vmem:[#allocation2 + $0x1e8] ss:$20 sps:$4 sm:$0xff]  }
  0x38   :  { %1718 = vmatpush1.bf16.msra.mxu0 %v4757_v18  ;;  %1890 = vmatpush1.bf16.msra.mxu1 %v4758_v19  ;;  %v4805_v51 = vld [vmem:[#allocation2 + $0x1e0] ss:$20 sps:$4 sm:$0xff]   ;;  %v4811_v55 = vld [vmem:[#allocation2 + $0x208] ss:$20 sps:$4 sm:$0xff]   ;;  %v4812_v56 = vld [vmem:[#allocation2 + $0x210] ss:$20 sps:$4 sm:$0xff]  }
  0x39   :  { %1719 = vmatprep.subr.bf16.mxu0 %v4759_v20  ;;  %1891 = vmatprep.subr.bf16.mxu1 %v4761_v21  ;;  %v4807_v53 = vld [vmem:[#allocation2 + $0x20c] ss:$20 sps:$4 sm:$0xff]   ;;  %v4813_v57 = vld [vmem:[#allocation2 + $0x234] ss:$20 sps:$4 sm:$0xff]   ;;  %v4815_v58 = vld [vmem:[#allocation2 + $0x23c] ss:$20 sps:$4 sm:$0xff]  }
  0x3a   :  { %v4817_v59 = vld [vmem:[#allocation2 + $0x230] ss:$20 sps:$4 sm:$0xff]   ;;  %v4818_v60 = vld [vmem:[#allocation2 + $0x238] ss:$20 sps:$4 sm:$0xff]   ;;  %v4824_v0 = vld [vmem:[#allocation2 + $0x260] ss:$20 sps:$4 sm:$0xff]  }
  0x3b   :  { %v4819_v61 = vld [vmem:[#allocation2 + $0x25c] ss:$20 sps:$4 sm:$0xff]   ;;  %v4821_v62 = vld [vmem:[#allocation2 + $0x264] ss:$20 sps:$4 sm:$0xff]   ;;  %v4832_v2 = vld [vmem:[#allocation2 + $0x28c] ss:$20 sps:$4 sm:$0xff]  }
  0x3c   :  { %1720 = vmatpush1.bf16.msra.mxu0 %v4763_v22  ;;  %1892 = vmatpush1.bf16.msra.mxu1 %v4764_v23  ;;  %v4823_v63 = vld [vmem:[#allocation2 + $0x258] ss:$20 sps:$4 sm:$0xff]   ;;  %v4827_v3 = vld [vmem:[#allocation2 + $0x280] ss:$20 sps:$4 sm:$0xff]   ;;  %v4830_v4 = vld [vmem:[#allocation2 + $0x288] ss:$20 sps:$4 sm:$0xff]  }
  0x3d   :  { %1721 = vmatprep.subr.bf16.mxu0 %v4765_v24  ;;  %1893 = vmatprep.subr.bf16.mxu1 %v4767_v25  ;;  %v4829_v1 = vld [vmem:[#allocation2 + $0x284] ss:$20 sps:$4 sm:$0xff]   ;;  %v4833_v5 = vld [vmem:[%s5852_s0] ss:$28 sps:$4 sm:$0xff]   ;;  %v4839_v7 = vld [vmem:[#allocation2 + $0x2b4] ss:$20 sps:$4 sm:$0xff]  }
  0x3e   :  { %v4836_v6 = vld [vmem:[#allocation2 + $0x2ac] ss:$20 sps:$4 sm:$0xff]   ;;  %v4834_v8 = vld [vmem:[#allocation2 + $0x2a8] ss:$20 sps:$4 sm:$0xff]   ;;  %v4837_v9 = vld [vmem:[#allocation2 + $0x2b0] ss:$20 sps:$4 sm:$0xff]  }
  0x3f   :  { %v4842_v10 = vld [vmem:[#allocation2 + $0x2d4] ss:$20 sps:$4 sm:$0xff]   ;;  %v4845_v11 = vld [vmem:[#allocation2 + $0x2dc] ss:$20 sps:$4 sm:$0xff]   ;;  %v4843_v13 = vld [vmem:[#allocation2 + $0x2d8] ss:$20 sps:$4 sm:$0xff]  }
  0x40   :  { %1722 = vmatpush1.bf16.msra.mxu0 %v4769_v26  ;;  %1894 = vmatpush1.bf16.msra.mxu1 %v4770_v27  ;;  %v4840_v12 = vld [vmem:[#allocation2 + $0x2d0] ss:$20 sps:$4 sm:$0xff]   ;;  %v4846_v16 = vld [vmem:[#allocation2 + $0x2f8] ss:$20 sps:$4 sm:$0xff]   ;;  %v4849_v17 = vld [vmem:[#allocation2 + $0x300] ss:$20 sps:$4 sm:$0xff]  }
  0x41   :  { %1723 = vmatprep.subr.bf16.mxu0 %v4771_v28  ;;  %1895 = vmatprep.subr.bf16.mxu1 %v4773_v29  ;;  %v4848_v14 = vld [vmem:[#allocation2 + $0x2fc] ss:$20 sps:$4 sm:$0xff]   ;;  %v4851_v15 = vld [vmem:[#allocation2 + $0x304] ss:$20 sps:$4 sm:$0xff]   ;;  %v4857_v19 = vld [vmem:[#allocation2 + $0x32c] ss:$20 sps:$4 sm:$0xff]  }
  0x42   :  { %v4854_v18 = vld [vmem:[#allocation2 + $0x324] ss:$20 sps:$4 sm:$0xff]   ;;  %v4852_v20 = vld [vmem:[#allocation2 + $0x320] ss:$20 sps:$4 sm:$0xff]   ;;  %v4855_v21 = vld [vmem:[#allocation2 + $0x328] ss:$20 sps:$4 sm:$0xff]  }
  0x43   :  { %v4860_v22 = vld [vmem:[#allocation2 + $0x34c] ss:$20 sps:$4 sm:$0xff]   ;;  %v4863_v23 = vld [vmem:[#allocation2 + $0x354] ss:$20 sps:$4 sm:$0xff]   ;;  %v4861_v25 = vld [vmem:[#allocation2 + $0x350] ss:$20 sps:$4 sm:$0xff]  }
  0x44   :  { %1724 = vmatpush1.bf16.msra.mxu0 %v4775_v30  ;;  %1896 = vmatpush1.bf16.msra.mxu1 %v4776_v31  ;;  %v4858_v24 = vld [vmem:[#allocation2 + $0x348] ss:$20 sps:$4 sm:$0xff]   ;;  %v4864_v28 = vld [vmem:[#allocation2 + $0x370] ss:$20 sps:$4 sm:$0xff]   ;;  %v4867_v29 = vld [vmem:[#allocation2 + $0x378] ss:$20 sps:$4 sm:$0xff]  }
  0x45   :  { %1725 = vmatprep.subr.bf16.mxu0 %v4777_v32  ;;  %1897 = vmatprep.subr.bf16.mxu1 %v4779_v33  ;;  %v4866_v26 = vld [vmem:[#allocation2 + $0x374] ss:$20 sps:$4 sm:$0xff]   ;;  %v4869_v27 = vld [vmem:[#allocation2 + $0x37c] ss:$20 sps:$4 sm:$0xff]   ;;  %v4875_v32 = vld [vmem:[#allocation2 + $0x3a4] ss:$20 sps:$4 sm:$0xff]  }
  0x46   :  { %v5498_v30 = vld [vmem:[%s5852_s0 + $0xc] ss:$28 sps:$4 sm:$0xff]   ;;  %v4872_v31 = vld [vmem:[#allocation2 + $0x39c] ss:$20 sps:$4 sm:$0xff]   ;;  %vm1705_vm0 = vcmask 130048   ;;  %vm5404_vm1 = vmmov 0  }
  0x47   :  { %v4870_v33 = vld [vmem:[#allocation2 + $0x398] ss:$20 sps:$4 sm:$0xff]   ;;  %v4896_v47 = vld [vmem:[#allocation2 + $0x43c] ss:$20 sps:$4 sm:$0xff]  }
  0x48   :  { %1726 = vmatpush1.bf16.msra.mxu0 %v4781_v34  ;;  %1898 = vmatpush1.bf16.msra.mxu1 %v4782_v35  ;;  %v4873_v34 = vld [vmem:[#allocation2 + $0x3a0] ss:$20 sps:$4 sm:$0xff]   ;;  %v4878_v35 = vld [vmem:[#allocation2 + $0x3c4] ss:$20 sps:$4 sm:$0xff]  }
  0x49   :  { %1727 = vmatprep.subr.bf16.mxu0 %v4783_v36  ;;  %1899 = vmatprep.subr.bf16.mxu1 %v4785_v37  ;;  %v4881_v36 = vld [vmem:[#allocation2 + $0x3cc] ss:$20 sps:$4 sm:$0xff]  }
  0x4a   :  { %v4876_v37 = vld [vmem:[#allocation2 + $0x3c0] ss:$20 sps:$4 sm:$0xff]  }
  0x4c   :  { %1728 = vmatpush1.bf16.msra.mxu0 %v4787_v38  ;;  %1900 = vmatpush1.bf16.msra.mxu1 %v4788_v39  ;;  %v4879_v38 = vld [vmem:[#allocation2 + $0x3c8] ss:$20 sps:$4 sm:$0xff]   ;;  %v4884_v39 = vld [vmem:[#allocation2 + $0x3ec] ss:$20 sps:$4 sm:$0xff]  }
  0x4d   :  { %1729 = vmatprep.subr.bf16.mxu0 %v4789_v40  ;;  %1901 = vmatprep.subr.bf16.mxu1 %v4791_v41  ;;  %v4887_v40 = vld [vmem:[#allocation2 + $0x3f4] ss:$20 sps:$4 sm:$0xff]  }
  0x4e   :  { %v4882_v41 = vld [vmem:[#allocation2 + $0x3e8] ss:$20 sps:$4 sm:$0xff]  }
  0x50   :  { %1730 = vmatpush1.bf16.msra.mxu0 %v4793_v42  ;;  %1902 = vmatpush1.bf16.msra.mxu1 %v4794_v43  ;;  %v4885_v42 = vld [vmem:[#allocation2 + $0x3f0] ss:$20 sps:$4 sm:$0xff]   ;;  %v4890_v43 = vld [vmem:[#allocation2 + $0x414] ss:$20 sps:$4 sm:$0xff]  }
  0x51   :  { %1731 = vmatprep.subr.bf16.mxu0 %v4795_v44  ;;  %1903 = vmatprep.subr.bf16.mxu1 %v4797_v45  ;;  %v4893_v44 = vld [vmem:[#allocation2 + $0x41c] ss:$20 sps:$4 sm:$0xff]  }
  0x52   :  { %v4888_v45 = vld [vmem:[#allocation2 + $0x410] ss:$20 sps:$4 sm:$0xff]  }
  0x54   :  { %1732 = vmatpush1.bf16.msra.mxu0 %v4799_v46  ;;  %1904 = vmatpush1.bf16.msra.mxu1 %v4800_v48  ;;  %v4891_v46 = vld [vmem:[#allocation2 + $0x418] ss:$20 sps:$4 sm:$0xff]  }
  0x55   :  { %1733 = vmatprep.subr.bf16.mxu0 %v4801_v49  ;;  %1905 = vmatprep.subr.bf16.mxu1 %v4803_v50  ;;  %v4899_v48 = vld [vmem:[#allocation2 + $0x444] ss:$20 sps:$4 sm:$0xff]   ;;  %v4897_v50 = vld [vmem:[#allocation2 + $0x440] ss:$20 sps:$4 sm:$0xff]  }
  0x56   :  { %v4894_v49 = vld [vmem:[#allocation2 + $0x438] ss:$20 sps:$4 sm:$0xff]  }
  0x58   :  { %1734 = vmatpush1.bf16.msra.mxu0 %v4805_v51  ;;  %1906 = vmatpush1.bf16.msra.mxu1 %v4806_v52  ;;  %v4902_v51 = vld [vmem:[#allocation2 + $0x464] ss:$20 sps:$4 sm:$0xff]   ;;  %v4905_v52 = vld [vmem:[#allocation2 + $0x46c] ss:$20 sps:$4 sm:$0xff]  }
  0x59   :  { %1735 = vmatprep.subr.bf16.mxu0 %v4807_v53  ;;  %1907 = vmatprep.subr.bf16.mxu1 %v4809_v54  ;;  %v4900_v53 = vld [vmem:[#allocation2 + $0x460] ss:$20 sps:$4 sm:$0xff]   ;;  %v4903_v54 = vld [vmem:[#allocation2 + $0x468] ss:$20 sps:$4 sm:$0xff]  }
  0x5c   :  { %1736 = vmatpush1.bf16.msra.mxu0 %v4811_v55  ;;  %1908 = vmatpush1.bf16.msra.mxu1 %v4812_v56  ;;  %v4908_v55 = vld [vmem:[#allocation2 + $0x48c] ss:$20 sps:$4 sm:$0xff]   ;;  %v4911_v56 = vld [vmem:[#allocation2 + $0x494] ss:$20 sps:$4 sm:$0xff]  }
  0x5d   :  { %1737 = vmatprep.subr.bf16.mxu0 %v4813_v57  ;;  %1909 = vmatprep.subr.bf16.mxu1 %v4815_v58  ;;  %v4906_v57 = vld [vmem:[#allocation2 + $0x488] ss:$20 sps:$4 sm:$0xff]   ;;  %v4909_v58 = vld [vmem:[#allocation2 + $0x490] ss:$20 sps:$4 sm:$0xff]  }
  0x60   :  { %1738 = vmatpush1.bf16.msra.mxu0 %v4817_v59  ;;  %1910 = vmatpush1.bf16.msra.mxu1 %v4818_v60  ;;  %v4914_v59 = vld [vmem:[#allocation2 + $0x4b4] ss:$20 sps:$4 sm:$0xff]   ;;  %v4917_v60 = vld [vmem:[#allocation2 + $0x4bc] ss:$20 sps:$4 sm:$0xff]  }
  0x61   :  { %1739 = vmatprep.subr.bf16.mxu0 %v4819_v61  ;;  %1911 = vmatprep.subr.bf16.mxu1 %v4821_v62  ;;  %v4912_v61 = vld [vmem:[#allocation2 + $0x4b0] ss:$20 sps:$4 sm:$0xff]   ;;  %v4915_v62 = vld [vmem:[#allocation2 + $0x4b8] ss:$20 sps:$4 sm:$0xff]  }
  0x64   :  { %1740 = vmatpush1.bf16.msra.mxu0 %v4823_v63  ;;  %1912 = vmatpush1.bf16.msra.mxu1 %v4824_v0  ;;  %v4920_v63 = vld [vmem:[#allocation2 + $0x4dc] ss:$20 sps:$4 sm:$0xff]   ;;  %v4923_v0 = vld [vmem:[#allocation2 + $0x4e4] ss:$20 sps:$4 sm:$0xff]  }
  0x65   :  { %1752 = vmatprep.subr.bf16.mxu0 %v4829_v1  ;;  %1924 = vmatprep.subr.bf16.mxu1 %v4832_v2  ;;  %v4918_v1 = vld [vmem:[#allocation2 + $0x4d8] ss:$20 sps:$4 sm:$0xff]   ;;  %v4921_v2 = vld [vmem:[#allocation2 + $0x4e0] ss:$20 sps:$4 sm:$0xff]  }
  0x67   :  { %1742 = vmatmul.mubr.bf16.vlgmr.msra.gmra.mrb[0].mxu0 %v4833_v5  ;;  %1914 = vmatmul.mubr.bf16.vlgmr.msra.gmra.mrb[0].mxu1 %v4833_v5  ;;  %v5505_v5 = vld [vmem:[%s5852_s0 + $0x8] ss:$28 sps:$4 sm:$0xff]  }
  0x68   :  { %1753 = vmatpush1.bf16.msra.mxu0 %v4827_v3  ;;  %1925 = vmatpush1.bf16.msra.mxu1 %v4830_v4  ;;  %v4929_v3 = vld [vmem:[#allocation2 + $0x504] ss:$20 sps:$4 sm:$0xff]   ;;  %v4932_v4 = vld [vmem:[#allocation2 + $0x50c] ss:$20 sps:$4 sm:$0xff]  }
  0x69   :  { %1754 = vmatprep.subr.bf16.mxu0 %v4836_v6  ;;  %1926 = vmatprep.subr.bf16.mxu1 %v4839_v7  ;;  %v4927_v6 = vld [vmem:[#allocation2 + $0x500] ss:$20 sps:$4 sm:$0xff]   ;;  %v4930_v7 = vld [vmem:[#allocation2 + $0x508] ss:$20 sps:$4 sm:$0xff]  }
  0x6a   :  { %1784 = vmatprep.mubr.bf16.mxu0 %v5498_v30  ;;  %1956 = vmatprep.mubr.bf16.mxu1 %v5498_v30 }
  0x6c   :  { %1755 = vmatpush1.bf16.msra.mxu0 %v4834_v8  ;;  %1927 = vmatpush1.bf16.msra.mxu1 %v4837_v9  ;;  %v4935_v8 = vld [vmem:[#allocation2 + $0x52c] ss:$20 sps:$4 sm:$0xff]   ;;  %v4938_v9 = vld [vmem:[#allocation2 + $0x534] ss:$20 sps:$4 sm:$0xff]  }
  0x6d   :  { %1756 = vmatprep.subr.bf16.mxu0 %v4842_v10  ;;  %1928 = vmatprep.subr.bf16.mxu1 %v4845_v11  ;;  %v4933_v10 = vld [vmem:[#allocation2 + $0x528] ss:$20 sps:$4 sm:$0xff]   ;;  %v4936_v11 = vld [vmem:[#allocation2 + $0x530] ss:$20 sps:$4 sm:$0xff]  }
  0x70   :  { %1757 = vmatpush1.bf16.msra.mxu0 %v4840_v12  ;;  %1929 = vmatpush1.bf16.msra.mxu1 %v4843_v13  ;;  %v5512_v12 = vld [vmem:[%s5852_s0 + $0x14] ss:$28 sps:$4 sm:$0xff]  }
  0x71   :  { %1758 = vmatprep.subr.bf16.mxu0 %v4848_v14  ;;  %1930 = vmatprep.subr.bf16.mxu1 %v4851_v15  ;;  %v4941_v13 = vld [vmem:[#allocation2 + $0x554] ss:$20 sps:$4 sm:$0xff]   ;;  %v4944_v14 = vld [vmem:[#allocation2 + $0x55c] ss:$20 sps:$4 sm:$0xff]  }
  0x72   :  { %v4939_v15 = vld [vmem:[#allocation2 + $0x550] ss:$20 sps:$4 sm:$0xff]  }
  0x74   :  { %1759 = vmatpush1.bf16.msra.mxu0 %v4846_v16  ;;  %1931 = vmatpush1.bf16.msra.mxu1 %v4849_v17  ;;  %v4942_v16 = vld [vmem:[#allocation2 + $0x558] ss:$20 sps:$4 sm:$0xff]   ;;  %v4947_v17 = vld [vmem:[#allocation2 + $0x57c] ss:$20 sps:$4 sm:$0xff]  }
  0x75   :  { %1760 = vmatprep.subr.bf16.mxu0 %v4854_v18  ;;  %1932 = vmatprep.subr.bf16.mxu1 %v4857_v19  ;;  %v4950_v18 = vld [vmem:[#allocation2 + $0x584] ss:$20 sps:$4 sm:$0xff]  }
  0x76   :  { %v4945_v19 = vld [vmem:[#allocation2 + $0x578] ss:$20 sps:$4 sm:$0xff]  }
  0x78   :  { %1761 = vmatpush1.bf16.msra.mxu0 %v4852_v20  ;;  %1933 = vmatpush1.bf16.msra.mxu1 %v4855_v21  ;;  %v4948_v20 = vld [vmem:[#allocation2 + $0x580] ss:$20 sps:$4 sm:$0xff]   ;;  %v4953_v21 = vld [vmem:[#allocation2 + $0x5a4] ss:$20 sps:$4 sm:$0xff]  }
  0x79   :  { %1762 = vmatprep.subr.bf16.mxu0 %v4860_v22  ;;  %1934 = vmatprep.subr.bf16.mxu1 %v4863_v23  ;;  %v4956_v22 = vld [vmem:[#allocation2 + $0x5ac] ss:$20 sps:$4 sm:$0xff]  }
  0x7a   :  { %v4951_v23 = vld [vmem:[#allocation2 + $0x5a0] ss:$20 sps:$4 sm:$0xff]  }
  0x7c   :  { %1763 = vmatpush1.bf16.msra.mxu0 %v4858_v24  ;;  %1935 = vmatpush1.bf16.msra.mxu1 %v4861_v25  ;;  %v4954_v24 = vld [vmem:[#allocation2 + $0x5a8] ss:$20 sps:$4 sm:$0xff]   ;;  %v4959_v25 = vld [vmem:[#allocation2 + $0x5cc] ss:$20 sps:$4 sm:$0xff]  }
  0x7d   :  { %1764 = vmatprep.subr.bf16.mxu0 %v4866_v26  ;;  %1936 = vmatprep.subr.bf16.mxu1 %v4869_v27  ;;  %v4962_v26 = vld [vmem:[#allocation2 + $0x5d4] ss:$20 sps:$4 sm:$0xff]  }
  0x7e   :  { %v4957_v27 = vld [vmem:[#allocation2 + $0x5c8] ss:$20 sps:$4 sm:$0xff]  }
  0x80   :  { %1765 = vmatpush1.bf16.msra.mxu0 %v4864_v28  ;;  %1937 = vmatpush1.bf16.msra.mxu1 %v4867_v29  ;;  %v4960_v28 = vld [vmem:[#allocation2 + $0x5d0] ss:$20 sps:$4 sm:$0xff]   ;;  %v4965_v29 = vld [vmem:[#allocation2 + $0x5f4] ss:$20 sps:$4 sm:$0xff]  }
  0x81   :  { %1766 = vmatprep.subr.bf16.mxu0 %v4872_v31  ;;  %1938 = vmatprep.subr.bf16.mxu1 %v4875_v32  ;;  %v4968_v31 = vld [vmem:[#allocation2 + $0x5fc] ss:$20 sps:$4 sm:$0xff]  }
  0x82   :  { %v4963_v32 = vld [vmem:[#allocation2 + $0x5f0] ss:$20 sps:$4 sm:$0xff]  }
  0x84   :  { %1767 = vmatpush1.bf16.msra.mxu0 %v4870_v33  ;;  %1939 = vmatpush1.bf16.msra.mxu1 %v4873_v34  ;;  %v4966_v33 = vld [vmem:[#allocation2 + $0x5f8] ss:$20 sps:$4 sm:$0xff]   ;;  %v4971_v34 = vld [vmem:[#allocation2 + $0x61c] ss:$20 sps:$4 sm:$0xff]  }
  0x85   :  { %1768 = vmatprep.subr.bf16.mxu0 %v4878_v35  ;;  %1940 = vmatprep.subr.bf16.mxu1 %v4881_v36  ;;  %v4974_v35 = vld [vmem:[#allocation2 + $0x624] ss:$20 sps:$4 sm:$0xff]  }
  0x86   :  { %v4969_v36 = vld [vmem:[#allocation2 + $0x618] ss:$20 sps:$4 sm:$0xff]  }
  0x88   :  { %1769 = vmatpush1.bf16.msra.mxu0 %v4876_v37  ;;  %1941 = vmatpush1.bf16.msra.mxu1 %v4879_v38  ;;  %v4972_v37 = vld [vmem:[#allocation2 + $0x620] ss:$20 sps:$4 sm:$0xff]   ;;  %v4977_v38 = vld [vmem:[#allocation2 + $0x644] ss:$20 sps:$4 sm:$0xff]  }
  0x89   :  { %1770 = vmatprep.subr.bf16.mxu0 %v4884_v39  ;;  %1942 = vmatprep.subr.bf16.mxu1 %v4887_v40  ;;  %v4980_v39 = vld [vmem:[#allocation2 + $0x64c] ss:$20 sps:$4 sm:$0xff]  }
  0x8a   :  { %v4975_v40 = vld [vmem:[#allocation2 + $0x640] ss:$20 sps:$4 sm:$0xff]  }
  0x8c   :  { %1771 = vmatpush1.bf16.msra.mxu0 %v4882_v41  ;;  %1943 = vmatpush1.bf16.msra.mxu1 %v4885_v42  ;;  %v4978_v41 = vld [vmem:[#allocation2 + $0x648] ss:$20 sps:$4 sm:$0xff]   ;;  %v4983_v42 = vld [vmem:[#allocation2 + $0x66c] ss:$20 sps:$4 sm:$0xff]  }
  0x8d   :  { %1772 = vmatprep.subr.bf16.mxu0 %v4890_v43  ;;  %1944 = vmatprep.subr.bf16.mxu1 %v4893_v44  ;;  %v4986_v43 = vld [vmem:[#allocation2 + $0x674] ss:$20 sps:$4 sm:$0xff]  }
  0x8e   :  { %v4981_v44 = vld [vmem:[#allocation2 + $0x668] ss:$20 sps:$4 sm:$0xff]  }
  0x90   :  { %1773 = vmatpush1.bf16.msra.mxu0 %v4888_v45  ;;  %1945 = vmatpush1.bf16.msra.mxu1 %v4891_v46  ;;  %v4984_v45 = vld [vmem:[#allocation2 + $0x670] ss:$20 sps:$4 sm:$0xff]   ;;  %v4989_v46 = vld [vmem:[#allocation2 + $0x694] ss:$20 sps:$4 sm:$0xff]  }
  0x91   :  { %1774 = vmatprep.subr.bf16.mxu0 %v4896_v47  ;;  %1946 = vmatprep.subr.bf16.mxu1 %v4899_v48  ;;  %v4992_v47 = vld [vmem:[#allocation2 + $0x69c] ss:$20 sps:$4 sm:$0xff]  }
  0x92   :  { %v4987_v48 = vld [vmem:[#allocation2 + $0x690] ss:$20 sps:$4 sm:$0xff]  }
  0x94   :  { %1775 = vmatpush1.bf16.msra.mxu0 %v4894_v49  ;;  %1947 = vmatpush1.bf16.msra.mxu1 %v4897_v50  ;;  %v4990_v49 = vld [vmem:[#allocation2 + $0x698] ss:$20 sps:$4 sm:$0xff]   ;;  %v4995_v50 = vld [vmem:[#allocation2 + $0x6bc] ss:$20 sps:$4 sm:$0xff]  }
  0x95   :  { %1776 = vmatprep.subr.bf16.mxu0 %v4902_v51  ;;  %1948 = vmatprep.subr.bf16.mxu1 %v4905_v52  ;;  %v4998_v51 = vld [vmem:[#allocation2 + $0x6c4] ss:$20 sps:$4 sm:$0xff]  }
  0x96   :  { %v4993_v52 = vld [vmem:[#allocation2 + $0x6b8] ss:$20 sps:$4 sm:$0xff]  }
  0x98   :  { %1777 = vmatpush1.bf16.msra.mxu0 %v4900_v53  ;;  %1949 = vmatpush1.bf16.msra.mxu1 %v4903_v54  ;;  %v4996_v53 = vld [vmem:[#allocation2 + $0x6c0] ss:$20 sps:$4 sm:$0xff]   ;;  %v5001_v54 = vld [vmem:[#allocation2 + $0x6e4] ss:$20 sps:$4 sm:$0xff]  }
  0x99   :  { %1778 = vmatprep.subr.bf16.mxu0 %v4908_v55  ;;  %1950 = vmatprep.subr.bf16.mxu1 %v4911_v56  ;;  %v5004_v55 = vld [vmem:[#allocation2 + $0x6ec] ss:$20 sps:$4 sm:$0xff]  }
  0x9a   :  { %v4999_v56 = vld [vmem:[#allocation2 + $0x6e0] ss:$20 sps:$4 sm:$0xff]  }
  0x9c   :  { %1779 = vmatpush1.bf16.msra.mxu0 %v4906_v57  ;;  %1951 = vmatpush1.bf16.msra.mxu1 %v4909_v58  ;;  %v5002_v57 = vld [vmem:[#allocation2 + $0x6e8] ss:$20 sps:$4 sm:$0xff]   ;;  %v5007_v58 = vld [vmem:[#allocation2 + $0x70c] ss:$20 sps:$4 sm:$0xff]  }
  0x9d   :  { %1780 = vmatprep.subr.bf16.mxu0 %v4914_v59  ;;  %1952 = vmatprep.subr.bf16.mxu1 %v4917_v60  ;;  %v5010_v59 = vld [vmem:[#allocation2 + $0x714] ss:$20 sps:$4 sm:$0xff]  }
  0x9e   :  { %v5005_v60 = vld [vmem:[#allocation2 + $0x708] ss:$20 sps:$4 sm:$0xff]  }
  0xa0   :  { %1781 = vmatpush1.bf16.msra.mxu0 %v4912_v61  ;;  %1953 = vmatpush1.bf16.msra.mxu1 %v4915_v62  ;;  %v5008_v61 = vld [vmem:[#allocation2 + $0x710] ss:$20 sps:$4 sm:$0xff]   ;;  %v5013_v62 = vld [vmem:[#allocation2 + $0x734] ss:$20 sps:$4 sm:$0xff]  }
  0xa1   :  { %1782 = vmatprep.subr.bf16.mxu0 %v4920_v63  ;;  %1954 = vmatprep.subr.bf16.mxu1 %v4923_v0  ;;  %v5016_v63 = vld [vmem:[#allocation2 + $0x73c] ss:$20 sps:$4 sm:$0xff]  }
  0xa2   :  { %v5011_v0 = vld [vmem:[#allocation2 + $0x730] ss:$20 sps:$4 sm:$0xff]  }
  0xa4   :  { %1783 = vmatpush1.bf16.msra.mxu0 %v4918_v1  ;;  %1955 = vmatpush1.bf16.msra.mxu1 %v4921_v2  ;;  %v5014_v1 = vld [vmem:[#allocation2 + $0x738] ss:$20 sps:$4 sm:$0xff]   ;;  %v5019_v2 = vld [vmem:[#allocation2 + $0x75c] ss:$20 sps:$4 sm:$0xff]  }
  0xa5   :  { %1795 = vmatprep.subr.bf16.mxu0 %v4929_v3  ;;  %1967 = vmatprep.subr.bf16.mxu1 %v4932_v4  ;;  %v5022_v3 = vld [vmem:[#allocation2 + $0x764] ss:$20 sps:$4 sm:$0xff]  }
  0xa6   :  { %v5017_v4 = vld [vmem:[#allocation2 + $0x758] ss:$20 sps:$4 sm:$0xff]  }
  0xa7   :  { %1785 = vmatmul.mubr.bf16.vlgmr.msra.gmra.mrb[0].mxu0 %v5505_v5  ;;  %1957 = vmatmul.mubr.bf16.vlgmr.msra.gmra.mrb[0].mxu1 %v5505_v5 }
  0xa8   :  { %1796 = vmatpush1.bf16.msra.mxu0 %v4927_v6  ;;  %1968 = vmatpush1.bf16.msra.mxu1 %v4930_v7  ;;  %v5020_v6 = vld [vmem:[#allocation2 + $0x760] ss:$20 sps:$4 sm:$0xff]   ;;  %v5028_v7 = vld [vmem:[#allocation2 + $0x784] ss:$20 sps:$4 sm:$0xff]  }
  0xa9   :  { %1797 = vmatprep.subr.bf16.mxu0 %v4935_v8  ;;  %1969 = vmatprep.subr.bf16.mxu1 %v4938_v9  ;;  %v5031_v8 = vld [vmem:[#allocation2 + $0x78c] ss:$20 sps:$4 sm:$0xff]  }
  0xaa   :  { %1827 = vmatprep.mubr.bf16.mxu0 %v5512_v12  ;;  %1999 = vmatprep.mubr.bf16.mxu1 %v5512_v12  ;;  %v5519_v9 = vld [vmem:[%s5852_s0 + $0x10] ss:$28 sps:$4 sm:$0xff]  }
  0xac   :  { %1798 = vmatpush1.bf16.msra.mxu0 %v4933_v10  ;;  %1970 = vmatpush1.bf16.msra.mxu1 %v4936_v11  ;;  %v5026_v10 = vld [vmem:[#allocation2 + $0x780] ss:$20 sps:$4 sm:$0xff]   ;;  %v5029_v11 = vld [vmem:[#allocation2 + $0x788] ss:$20 sps:$4 sm:$0xff]  }
  0xad   :  { %1799 = vmatprep.subr.bf16.mxu0 %v4941_v13  ;;  %1971 = vmatprep.subr.bf16.mxu1 %v4944_v14  ;;  %v5032_v13 = vld [vmem:[#allocation2 + $0x150] ss:$20 sps:$4 sm:$0xff]  }
  0xae   :  { %v5049_v14 = vld [vmem:[#allocation2 + $0x3d0] ss:$20 sps:$4 sm:$0xff]  }
  0xb0   :  { %1800 = vmatpush1.bf16.msra.mxu0 %v4939_v15  ;;  %1972 = vmatpush1.bf16.msra.mxu1 %v4942_v16  ;;  %v5402_v15 = vmov 0   ;;  %v5528_v16 = vld [vmem:[%s5852_s0 + $0x18] ss:$28 sps:$4 sm:$0xff]  }
  0xb1   :  { %1801 = vmatprep.subr.bf16.mxu0 %v4947_v17  ;;  %1973 = vmatprep.subr.bf16.mxu1 %v4950_v18  ;;  %v5034_v17 = vld [vmem:[#allocation2 + $0x10] ss:$20 sps:$4 sm:$0xff]  }
  0xb2   :  { %v5050_v18 = vld [vmem:[#allocation2 + $0x290] ss:$20 sps:$4 sm:$0xff]  }
  0xb4   :  { %1802 = vmatpush1.bf16.msra.mxu0 %v4945_v19  ;;  %1974 = vmatpush1.bf16.msra.mxu1 %v4948_v20  ;;  %v5035_v19 = vld [vmem:[#allocation2 + $0x178] ss:$20 sps:$4 sm:$0xff]  }
  0xb5   :  { %1803 = vmatprep.subr.bf16.mxu0 %v4953_v21  ;;  %1975 = vmatprep.subr.bf16.mxu1 %v4956_v22  ;;  %v5036_v20 = vld [vmem:[#allocation2 + $0x38] ss:$20 sps:$4 sm:$0xff]   ;;  %v5037_v22 = vld [vmem:[#allocation2 + $0x1a0] ss:$20 sps:$4 sm:$0xff]  }
  0xb6   :  { %v5052_v21 = vld [vmem:[#allocation2 + $0x3f8] ss:$20 sps:$4 sm:$0xff]  }
  0xb8   :  { %1804 = vmatpush1.bf16.msra.mxu0 %v4951_v23  ;;  %1976 = vmatpush1.bf16.msra.mxu1 %v4954_v24  ;;  %v5054_v23 = vld [vmem:[#allocation2 + $0x2b8] ss:$20 sps:$4 sm:$0xff]   ;;  %v5346_v24 = vld [vmem:[%s5852_s0 + $0x4] ss:$28 sps:$4 sm:$0xff]  }
  0xb9   :  { %1805 = vmatprep.subr.bf16.mxu0 %v4959_v25  ;;  %1977 = vmatprep.subr.bf16.mxu1 %v4962_v26  ;;  %v5056_v25 = vld [vmem:[#allocation2 + $0x420] ss:$20 sps:$4 sm:$0xff]  }
  0xba   :  { %v5038_v26 = vld [vmem:[#allocation2 + $0x60] ss:$20 sps:$4 sm:$0xff]  }
  0xbc   :  { %1806 = vmatpush1.bf16.msra.mxu0 %v4957_v27  ;;  %1978 = vmatpush1.bf16.msra.mxu1 %v4960_v28  ;;  %v5058_v27 = vld [vmem:[#allocation2 + $0x2e0] ss:$20 sps:$4 sm:$0xff]   ;;  %v5039_v28 = vld [vmem:[#allocation2 + $0x1c8] ss:$20 sps:$4 sm:$0xff]  }
  0xbd   :  { %1807 = vmatprep.subr.bf16.mxu0 %v4965_v29  ;;  %1979 = vmatprep.subr.bf16.mxu1 %v4968_v31  ;;  %v5060_v29 = vld [vmem:[#allocation2 + $0x448] ss:$20 sps:$4 sm:$0xff]  }
  0xbe   :  { %v5040_v31 = vld [vmem:[#allocation2 + $0x88] ss:$20 sps:$4 sm:$0xff]  }
  0xc0   :  { %1808 = vmatpush1.bf16.msra.mxu0 %v4963_v32  ;;  %1980 = vmatpush1.bf16.msra.mxu1 %v4966_v33  ;;  %v5041_v32 = vld [vmem:[#allocation2 + $0x1f0] ss:$20 sps:$4 sm:$0xff]   ;;  %v5062_v33 = vld [vmem:[#allocation2 + $0x308] ss:$20 sps:$4 sm:$0xff]  }
  0xc1   :  { %1809 = vmatprep.subr.bf16.mxu0 %v4971_v34  ;;  %1981 = vmatprep.subr.bf16.mxu1 %v4974_v35  ;;  %v5064_v34 = vld [vmem:[#allocation2 + $0x470] ss:$20 sps:$4 sm:$0xff]  }
  0xc2   :  { %v5042_v35 = vld [vmem:[#allocation2 + $0xb0] ss:$20 sps:$4 sm:$0xff]  }
  0xc4   :  { %1810 = vmatpush1.bf16.msra.mxu0 %v4969_v36  ;;  %1982 = vmatpush1.bf16.msra.mxu1 %v4972_v37  ;;  %v5066_v36 = vld [vmem:[#allocation2 + $0x330] ss:$20 sps:$4 sm:$0xff]   ;;  %v5043_v37 = vld [vmem:[#allocation2 + $0x218] ss:$20 sps:$4 sm:$0xff]  }
  0xc5   :  { %1811 = vmatprep.subr.bf16.mxu0 %v4977_v38  ;;  %1983 = vmatprep.subr.bf16.mxu1 %v4980_v39  ;;  %v5044_v38 = vld [vmem:[#allocation2 + $0xd8] ss:$20 sps:$4 sm:$0xff]  }
  0xc6   :  { %v5070_v39 = vld [vmem:[#allocation2 + $0x358] ss:$20 sps:$4 sm:$0xff]  }
  0xc8   :  { %1812 = vmatpush1.bf16.msra.mxu0 %v4975_v40  ;;  %1984 = vmatpush1.bf16.msra.mxu1 %v4978_v41  ;;  %v5045_v40 = vld [vmem:[#allocation2 + $0x240] ss:$20 sps:$4 sm:$0xff]  }
  0xc9   :  { %1813 = vmatprep.subr.bf16.mxu0 %v4983_v42  ;;  %1985 = vmatprep.subr.bf16.mxu1 %v4986_v43  ;;  %v5072_v41 = vld [vmem:[#allocation2 + $0x4c0] ss:$20 sps:$4 sm:$0xff]  }
  0xca   :  { %v5046_v42 = vld [vmem:[#allocation2 + $0x100] ss:$20 sps:$4 sm:$0xff]  }
  0xcb   :  { %v5074_v43 = vld [vmem:[#allocation2 + $0x380] ss:$20 sps:$4 sm:$0xff]  }
  0xcc   :  { %1814 = vmatpush1.bf16.msra.mxu0 %v4981_v44  ;;  %1986 = vmatpush1.bf16.msra.mxu1 %v4984_v45  ;;  %v5047_v44 = vld [vmem:[#allocation2 + $0x268] ss:$20 sps:$4 sm:$0xff]  }
  0xcd   :  { %1815 = vmatprep.subr.bf16.mxu0 %v4989_v46  ;;  %1987 = vmatprep.subr.bf16.mxu1 %v4992_v47  ;;  %v5076_v45 = vld [vmem:[#allocation2 + $0x4e8] ss:$20 sps:$4 sm:$0xff]  }
  0xce   :  { %v5048_v46 = vld [vmem:[#allocation2 + $0x128] ss:$20 sps:$4 sm:$0xff]  }
  0xcf   :  { %v5078_v47 = vld [vmem:[#allocation2 + $0x3a8] ss:$20 sps:$4 sm:$0xff]  }
  0xd0   :  { %1816 = vmatpush1.bf16.msra.mxu0 %v4987_v48  ;;  %1988 = vmatpush1.bf16.msra.mxu1 %v4990_v49  ;;  %v5051_v48 = vld [vmem:[#allocation2 + $0x650] ss:$20 sps:$4 sm:$0xff]  }
  0xd1   :  { %1817 = vmatprep.subr.bf16.mxu0 %v4995_v50  ;;  %1989 = vmatprep.subr.bf16.mxu1 %v4998_v51  ;;  %v5053_v49 = vld [vmem:[#allocation2 + $0x510] ss:$20 sps:$4 sm:$0xff]   ;;  %v5055_v50 = vld [vmem:[#allocation2 + $0x678] ss:$20 sps:$4 sm:$0xff]  }
  0xd2   :  { %v5081_v51 = vld [vmem:[#allocation2 + $0x790] ss:$20 sps:$4 sm:$0xff]  }
  0xd4   :  { %1818 = vmatpush1.bf16.msra.mxu0 %v4993_v52  ;;  %1990 = vmatpush1.bf16.msra.mxu1 %v4996_v53  ;;  %v5084_v52 = vld [vmem:[#allocation4 + $0x4] ss:$12 sps:$4 sm:$0xff]   ;;  %v5403_v53 = vmov 0.0  }
  0xd5   :  { %1819 = vmatprep.subr.bf16.mxu0 %v5001_v54  ;;  %1991 = vmatprep.subr.bf16.mxu1 %v5004_v55  ;;  %v5057_v54 = vld [vmem:[#allocation2 + $0x538] ss:$20 sps:$4 sm:$0xff]   ;;  %v5347_v55 = vld [vmem:[%s5852_s0] ss:$28 sps:$4 sm:$0xff]  }
  0xd8   :  { %1820 = vmatpush1.bf16.msra.mxu0 %v4999_v56  ;;  %1992 = vmatpush1.bf16.msra.mxu1 %v5002_v57  ;;  %v5059_v56 = vld [vmem:[#allocation2 + $0x6a0] ss:$20 sps:$4 sm:$0xff]  }
  0xd9   :  { %1821 = vmatprep.subr.bf16.mxu0 %v5007_v58  ;;  %1993 = vmatprep.subr.bf16.mxu1 %v5010_v59  ;;  %v5061_v57 = vld [vmem:[#allocation2 + $0x560] ss:$20 sps:$4 sm:$0xff]   ;;  %v5063_v59 = vld [vmem:[#allocation2 + $0x6c8] ss:$20 sps:$4 sm:$0xff]  }
  0xda   :  { %v5082_v58 = vld [vmem:[#allocation4] ss:$12 sps:$4 sm:$0xff]  }
  0xdc   :  { %1822 = vmatpush1.bf16.msra.mxu0 %v5005_v60  ;;  %1994 = vmatpush1.bf16.msra.mxu1 %v5008_v61  ;;  %v5087_v60 = vld [vmem:[#allocation4 + $0x1c] ss:$12 sps:$4 sm:$0xff]   ;;  %v5065_v61 = vld [vmem:[#allocation2 + $0x588] ss:$20 sps:$4 sm:$0xff]  }
  0xdd   :  { %1823 = vmatprep.subr.bf16.mxu0 %v5013_v62  ;;  %1995 = vmatprep.subr.bf16.mxu1 %v5016_v63  ;;  %v5085_v62 = vld [vmem:[#allocation4 + $0x18] ss:$12 sps:$4 sm:$0xff]   ;;  %v5067_v63 = vld [vmem:[#allocation2 + $0x6f0] ss:$20 sps:$4 sm:$0xff]  }
  0xe0   :  { %1824 = vmatpush1.bf16.msra.mxu0 %v5011_v0  ;;  %1996 = vmatpush1.bf16.msra.mxu1 %v5014_v1  ;;  %v5088_v0 = vld [vmem:[#allocation4 + $0x30] ss:$12 sps:$4 sm:$0xff]  }
  0xe1   :  { %1825 = vmatprep.subr.bf16.mxu0 %v5019_v2  ;;  %1997 = vmatprep.subr.bf16.mxu1 %v5022_v3  ;;  %v5071_v1 = vld [vmem:[#allocation2 + $0x718] ss:$20 sps:$4 sm:$0xff]   ;;  %v5093_v2 = vld [vmem:[#allocation4 + $0x4c] ss:$12 sps:$4 sm:$0xff]  }
  0xe2   :  { %v5073_v3 = vld [vmem:[#allocation2 + $0x5d8] ss:$20 sps:$4 sm:$0xff]  }
  0xe4   :  { %1826 = vmatpush1.bf16.msra.mxu0 %v5017_v4  ;;  %1998 = vmatpush1.bf16.msra.mxu1 %v5020_v6  ;;  %v5091_v4 = vld [vmem:[#allocation4 + $0x48] ss:$12 sps:$4 sm:$0xff]   ;;  %v5075_v6 = vld [vmem:[#allocation2 + $0x740] ss:$20 sps:$4 sm:$0xff]  }
  0xe5   :  { %1838 = vmatprep.subr.bf16.mxu0 %v5028_v7  ;;  %2010 = vmatprep.subr.bf16.mxu1 %v5031_v8  ;;  %v5096_v7 = vld [vmem:[#allocation4 + $0x64] ss:$12 sps:$4 sm:$0xff]   ;;  %v5077_v8 = vld [vmem:[#allocation2 + $0x600] ss:$20 sps:$4 sm:$0xff]  }
  0xe7   :  { %1828 = vmatmul.mubr.bf16.vlgmr.msra.gmra.mrb[0].mxu0 %v5519_v9  ;;  %2000 = vmatmul.mubr.bf16.vlgmr.msra.gmra.mrb[0].mxu1 %v5519_v9 }
  0xe8   :  { %1839 = vmatpush1.bf16.msra.mxu0 %v5026_v10  ;;  %2011 = vmatpush1.bf16.msra.mxu1 %v5029_v11  ;;  %v5094_v10 = vld [vmem:[#allocation4 + $0x60] ss:$12 sps:$4 sm:$0xff]  }
  0xe9   :  { %1870 = vmatprep.mubr.bf16.mxu0 %v5402_v15  ;;  %2042 = vmatprep.mubr.bf16.mxu1 %v5402_v15  ;;  %v5079_v11 = vld [vmem:[#allocation2 + $0x768] ss:$20 sps:$4 sm:$0xff]  }
  0xea   :  { %4470 = vmatprep.subr.bf16.mxu0 %v5032_v13  ;;  %4492 = vmatprep.subr.bf16.mxu1 %v5049_v14  ;;  %v5099_v13 = vld [vmem:[#allocation4 + $0x7c] ss:$12 sps:$4 sm:$0xff]   ;;  %v5080_v14 = vld [vmem:[#allocation2 + $0x628] ss:$20 sps:$4 sm:$0xff]  }
  0xf3   :  { %4273 = vmatmul.mubr.msk.bf16.vlgmr.msra.gmra.mrb[0].mxu0 %vm1705_vm0, %v5528_v16  ;;  %4274 = vmatmul.mubr.msk.bf16.vlgmr.msra.gmra.mrb[0].mxu1 %vm1705_vm0, %v5528_v16 }
  0xf4   :  { %4471 = vmatpush3.bf16.msra.mxu0 %v5034_v17  ;;  %4493 = vmatpush3.bf16.msra.mxu1 %v5050_v18  ;;  %v5102_v17 = vld [vmem:[#allocation4 + $0x94] ss:$12 sps:$4 sm:$0xff]  }
  0xf5   :  { %4472 = vmatprep.subr.bf16.mxu0 %v5035_v19  ;;  %2085 = vmatprep.mubr.bf16.mxu0 %v5346_v24  ;;  %v5109_v18 = vld [vmem:[#allocation4 + $0xc8] ss:$12 sps:$4 sm:$0xff]   ;;  %v5100_v19 = vld [vmem:[#allocation4 + $0x90] ss:$12 sps:$4 sm:$0xff]   ;;  %v5115_v24 = vld [vmem:[#allocation4 + $0x20] ss:$12 sps:$4 sm:$0xff]  }
  0xf6   :  { %4494 = vmatprep.subr.bf16.mxu1 %v5052_v21  ;;  %2126 = vmatprep.mubr.bf16.mxu1 %v5498_v30  ;;  %v5068_v30 = vld [vmem:[#allocation2 + $0x498] ss:$20 sps:$4 sm:$0xff]   ;;  %v5105_v21 = vld [vmem:[#allocation4 + $0xac] ss:$12 sps:$4 sm:$0xff]  }
  0xf8   :  { %4473 = vmatpush3.bf16.msra.mxu0 %v5036_v20  ;;  %4495 = vmatpush3.bf16.msra.mxu1 %v5054_v23  ;;  %v5110_v20 = vld [vmem:[#allocation4 + $0x8] ss:$12 sps:$4 sm:$0xff]  }
  0xf9   :  { %4474 = vmatprep.subr.bf16.mxu0 %v5037_v22  ;;  %4496 = vmatprep.subr.bf16.mxu1 %v5056_v25  ;;  %v5114_v22 = vld [vmem:[#allocation4 + $0xe0] ss:$12 sps:$4 sm:$0xff]   ;;  %v5103_v23 = vld [vmem:[#allocation4 + $0xa8] ss:$12 sps:$4 sm:$0xff]   ;;  %v5108_v25 = vld [vmem:[#allocation4 + $0xc4] ss:$12 sps:$4 sm:$0xff]  }
  0xfc   :  { %4475 = vmatpush3.bf16.msra.mxu0 %v5038_v26  ;;  %4497 = vmatpush3.bf16.msra.mxu1 %v5058_v27  ;;  %v5119_v26 = vld [vmem:[#allocation4 + $0xf8] ss:$12 sps:$4 sm:$0xff]   ;;  %v5106_v27 = vld [vmem:[#allocation4 + $0xc0] ss:$12 sps:$4 sm:$0xff]  }
  0xfd   :  { %4476 = vmatprep.subr.bf16.mxu0 %v5039_v28  ;;  %4498 = vmatprep.subr.bf16.mxu1 %v5060_v29  ;;  %v5120_v28 = vld [vmem:[#allocation4 + $0x38] ss:$12 sps:$4 sm:$0xff]   ;;  %v5113_v29 = vld [vmem:[#allocation4 + $0xdc] ss:$12 sps:$4 sm:$0xff]  }
 0x100   :  { %4477 = vmatpush3.bf16.msra.mxu0 %v5040_v31  ;;  %4499 = vmatpush3.bf16.msra.mxu1 %v5062_v33  ;;  %v5124_v31 = vld [vmem:[#allocation4 + $0x110] ss:$12 sps:$4 sm:$0xff]  }
 0x101   :  { %4478 = vmatprep.subr.bf16.mxu0 %v5041_v32  ;;  %4500 = vmatprep.subr.bf16.mxu1 %v5064_v34  ;;  %v5111_v32 = vld [vmem:[#allocation4 + $0xd8] ss:$12 sps:$4 sm:$0xff]   ;;  %v5125_v33 = vld [vmem:[#allocation4 + $0x50] ss:$12 sps:$4 sm:$0xff]   ;;  %v5118_v34 = vld [vmem:[#allocation4 + $0xf4] ss:$12 sps:$4 sm:$0xff]  }
 0x104   :  { %4479 = vmatpush3.bf16.msra.mxu0 %v5042_v35  ;;  %4501 = vmatpush3.bf16.msra.mxu1 %v5066_v36  ;;  %v5129_v35 = vld [vmem:[#allocation4 + $0x128] ss:$12 sps:$4 sm:$0xff]  }
 0x105   :  { %4480 = vmatprep.subr.bf16.mxu0 %v5043_v37  ;;  %4502 = vmatprep.subr.bf16.mxu1 %v5068_v30  ;;  %v5130_v36 = vld [vmem:[#allocation4 + $0x68] ss:$12 sps:$4 sm:$0xff]   ;;  %v5123_v37 = vld [vmem:[#allocation4 + $0x10c] ss:$12 sps:$4 sm:$0xff]  }
 0x106   :  { %v5134_v30 = vld [vmem:[#allocation4 + $0x140] ss:$12 sps:$4 sm:$0xff]  }
 0x108   :  { %4481 = vmatpush3.bf16.msra.mxu0 %v5044_v38  ;;  %4503 = vmatpush3.bf16.msra.mxu1 %v5070_v39  ;;  %v5121_v38 = vld [vmem:[#allocation4 + $0x108] ss:$12 sps:$4 sm:$0xff]   ;;  %v5135_v39 = vld [vmem:[#allocation4 + $0x80] ss:$12 sps:$4 sm:$0xff]  }
 0x109   :  { %4482 = vmatprep.subr.bf16.mxu0 %v5045_v40  ;;  %4504 = vmatprep.subr.bf16.mxu1 %v5072_v41  ;;  %v5128_v40 = vld [vmem:[#allocation4 + $0x124] ss:$12 sps:$4 sm:$0xff]  }
 0x10a   :  { %v5139_v41 = vld [vmem:[#allocation4 + $0x158] ss:$12 sps:$4 sm:$0xff]  }
 0x10c   :  { %4483 = vmatpush3.bf16.msra.mxu0 %v5046_v42  ;;  %4505 = vmatpush3.bf16.msra.mxu1 %v5074_v43  ;;  %v5126_v42 = vld [vmem:[#allocation4 + $0x120] ss:$12 sps:$4 sm:$0xff]   ;;  %v5140_v43 = vld [vmem:[#allocation4 + $0x98] ss:$12 sps:$4 sm:$0xff]  }
 0x10d   :  { %4484 = vmatprep.subr.bf16.mxu0 %v5047_v44  ;;  %4506 = vmatprep.subr.bf16.mxu1 %v5076_v45  ;;  %v5133_v44 = vld [vmem:[#allocation4 + $0x13c] ss:$12 sps:$4 sm:$0xff]  }
 0x10e   :  { %v5144_v45 = vld [vmem:[#allocation4 + $0x170] ss:$12 sps:$4 sm:$0xff]  }
 0x110   :  { %4485 = vmatpush3.bf16.msra.mxu0 %v5048_v46  ;;  %4507 = vmatpush3.bf16.msra.mxu1 %v5078_v47  ;;  %v5131_v46 = vld [vmem:[#allocation4 + $0x138] ss:$12 sps:$4 sm:$0xff]   ;;  %v5145_v47 = vld [vmem:[#allocation4 + $0xb0] ss:$12 sps:$4 sm:$0xff]  }
 0x111   :  { %4514 = vmatprep.subr.bf16.mxu0 %v5051_v48  ;;  %4622 = vmatprep.subr.bf16.mxu1 %v5403_v53  ;;  %v5138_v48 = vld [vmem:[#allocation4 + $0x154] ss:$12 sps:$4 sm:$0xff]  }
 0x113   :  { %2086 = vmatmul.mubr.bf16.vlgmr.msra.gmra.mrb[4].mxu0 %v5347_v55  ;;  %2127 = vmatmul.mubr.bf16.vlgmr.msra.gmra.mrb[4].mxu1 %v5505_v5  ;;  %v5090_v5 = vld [vmem:[#allocation4 + $0x34] ss:$12 sps:$4 sm:$0xff]   ;;  %v371_v55 = vlaneseq }
 0x114   :  { %4515 = vmatpush3.bf16.msra.mxu0 %v5053_v49  ;;  %2167 = vmatprep.mubr.bf16.mxu0 %v5512_v12  ;;  %v5069_v12 = vld [vmem:[#allocation2 + $0x5b0] ss:$20 sps:$4 sm:$0xff]  }
 0x115   :  { %4516 = vmatprep.subr.bf16.mxu0 %v5055_v50  ;;  %4623 = vmatpush3.bf16.msra.mxu1 %v5081_v51  ;;  %v5149_v49 = vld [vmem:[#allocation4 + $0x248] ss:$12 sps:$4 sm:$0xff]   ;;  %v5136_v50 = vld [vmem:[#allocation4 + $0x150] ss:$12 sps:$4 sm:$0xff]   ;;  %v5143_v51 = vld [vmem:[#allocation4 + $0x16c] ss:$12 sps:$4 sm:$0xff]  }
 0x116   :  { %4624 = vmatprep.mubr.msk.bf16.mxu1 %vm5404_vm1, %v5403_v53  ;;  %3049 = vmatprep.subr.bf16.mxu1 %v5084_v52  ;;  %v5141_v52 = vld [vmem:[#allocation4 + $0x168] ss:$12 sps:$4 sm:$0xff]  }
 0x118   :  { %4517 = vmatpush3.bf16.msra.mxu0 %v5057_v54  ;;  %v5148_v54 = vld [vmem:[#allocation4 + $0x184] ss:$12 sps:$4 sm:$0xff]  }
 0x119   :  { %4518 = vmatprep.subr.bf16.mxu0 %v5059_v56  ;;  %v5549_v56 = vshrl.u32 %v371_v55, 7  ;;  %v5178_v55 = vld [vmem:[#allocation4 + $0x214] ss:$12 sps:$4 sm:$0xff]  }
 0x11b   :  { %4625 = vmatmul.mubr.msk.bf16.vlgmr.msra.gmra.mrb[8].mxu1 %vm1705_vm0, %v5528_v16  ;;  %v5097_v16 = vld [vmem:[#allocation4 + $0x78] ss:$12 sps:$4 sm:$0xff]  }
 0x11c   :  { %4519 = vmatpush3.bf16.msra.mxu0 %v5061_v57  ;;  %3050 = vmatpush1.bf16.msra.mxu1 %v5082_v58  ;;  %v5552_v57 = vsub.s32 0, %v5549_v56  ;;  %v381_v58 = vsub.s32 2, %v5549_v56 }
 0x11d   :  { %4520 = vmatprep.subr.bf16.mxu0 %v5063_v59  ;;  %3051 = vmatprep.subr.bf16.mxu1 %v5087_v60  ;;  %v5558_v59 = vld [vmem:[%s5854_s2] sm:$0x1f]  ;;  %v5561_v60 = vsub.s32 1, %v5549_v56 }
 0x120   :  { %4521 = vmatpush3.bf16.msra.mxu0 %v5065_v61  ;;  %3052 = vmatpush1.bf16.msra.mxu1 %v5085_v62  ;;  %v385_v61 = vsub.s32 3, %v5549_v56  ;;  %v374_v62 = vrot.slane %v5558_v59, %v5552_v57 }
 0x121   :  { %4522 = vmatprep.subr.bf16.mxu0 %v5067_v63  ;;  %3053 = vmatprep.subr.bf16.mxu1 %v5090_v5  ;;  %v382_v63 = vrot.slane %v5558_v59, %v381_v58  ;;  %v378_v5 = vrot.slane %v5558_v59, %v5561_v60 }
 0x124   :  { %4523 = vmatpush3.bf16.msra.mxu0 %v5069_v12  ;;  %3054 = vmatpush1.bf16.msra.mxu1 %v5088_v0  ;;  %v386_v12 = vrot.slane %v5558_v59, %v385_v61  ;;  %v5179_v61 = vld [vmem:[#allocation4 + $0x2d8] ss:$12 sps:$4 sm:$0xff]  }
 0x125   :  { %4524 = vmatprep.subr.bf16.mxu0 %v5071_v1  ;;  %3055 = vmatprep.subr.bf16.mxu1 %v5093_v2 }
 0x128   :  { %4525 = vmatpush3.bf16.msra.mxu0 %v5073_v3  ;;  %3056 = vmatpush1.bf16.msra.mxu1 %v5091_v4 }
 0x129   :  { %4526 = vmatprep.subr.bf16.mxu0 %v5075_v6  ;;  %3057 = vmatprep.subr.bf16.mxu1 %v5096_v7 }
 0x12c   :  { %4527 = vmatpush3.bf16.msra.mxu0 %v5077_v8  ;;  %3058 = vmatpush1.bf16.msra.mxu1 %v5094_v10 }
 0x12d   :  { %4528 = vmatprep.subr.bf16.mxu0 %v5079_v11  ;;  %3059 = vmatprep.subr.bf16.mxu1 %v5099_v13 }
 0x130   :  { %4529 = vmatpush3.bf16.msra.mxu0 %v5080_v14  ;;  %3060 = vmatpush1.bf16.msra.mxu1 %v5097_v16 }
 0x131   :  { %3061 = vmatprep.subr.bf16.mxu1 %v5102_v17  ;;  %4538 = vmatprep.subr.bf16.mxu0 %v5109_v18 }
 0x133   :  { %2168 = vmatmul.mubr.bf16.vlgmr.msra.gmra.mrb[8].mxu0 %v5519_v9  ;;  %v5116_v9 = vld [vmem:[#allocation4 + $0xf0] ss:$12 sps:$4 sm:$0xff]  }
 0x134   :  { %3062 = vmatpush1.bf16.msra.mxu1 %v5100_v19  ;;  %4539 = vmatpush3.bf16.msra.mxu0 %v5110_v20 }
 0x135   :  { %3063 = vmatprep.subr.bf16.mxu1 %v5105_v21  ;;  %4540 = vmatprep.subr.bf16.mxu0 %v5114_v22 }
 0x138   :  { %3064 = vmatpush1.bf16.msra.mxu1 %v5103_v23  ;;  %4541 = vmatpush3.bf16.msra.mxu0 %v5115_v24 }
 0x139   :  { %3065 = vmatprep.subr.bf16.mxu1 %v5108_v25  ;;  %4542 = vmatprep.subr.bf16.mxu0 %v5119_v26 }
 0x13c   :  { %3066 = vmatpush1.bf16.msra.mxu1 %v5106_v27  ;;  %4543 = vmatpush3.bf16.msra.mxu0 %v5120_v28 }
 0x13d   :  { %3067 = vmatprep.subr.bf16.mxu1 %v5113_v29  ;;  %4544 = vmatprep.subr.bf16.mxu0 %v5124_v31 }
 0x140   :  { %3068 = vmatpush1.bf16.msra.mxu1 %v5111_v32  ;;  %4545 = vmatpush3.bf16.msra.mxu0 %v5125_v33  ;;  %v5146_v33 = vld [vmem:[#allocation4 + $0x180] ss:$12 sps:$4 sm:$0xff]  }
 0x141   :  { %3069 = vmatprep.subr.bf16.mxu1 %v5118_v34  ;;  %4546 = vmatprep.subr.bf16.mxu0 %v5129_v35  ;;  %v5150_v34 = vld [vmem:[#allocation4 + $0x188] ss:$12 sps:$4 sm:$0xff]  }
 0x142   :  { %v5153_v35 = vld [vmem:[#allocation4 + $0x19c] ss:$12 sps:$4 sm:$0xff]  }
 0x144   :  { %3070 = vmatpush1.bf16.msra.mxu1 %v5116_v9  ;;  %4547 = vmatpush3.bf16.msra.mxu0 %v5130_v36  ;;  %v5154_v9 = vld [vmem:[#allocation4 + $0x260] ss:$12 sps:$4 sm:$0xff]   ;;  %v5151_v36 = vld [vmem:[#allocation4 + $0x198] ss:$12 sps:$4 sm:$0xff]  }
 0x145   :  { %3071 = vmatprep.subr.bf16.mxu1 %v5123_v37  ;;  %4548 = vmatprep.subr.bf16.mxu0 %v5134_v30  ;;  %v5155_v37 = vld [vmem:[#allocation4 + $0x1a0] ss:$12 sps:$4 sm:$0xff]  }
 0x146   :  { %v5158_v30 = vld [vmem:[#allocation4 + $0x1b4] ss:$12 sps:$4 sm:$0xff]  }
 0x148   :  { %3072 = vmatpush1.bf16.msra.mxu1 %v5121_v38  ;;  %4549 = vmatpush3.bf16.msra.mxu0 %v5135_v39  ;;  %v5159_v38 = vld [vmem:[#allocation4 + $0x278] ss:$12 sps:$4 sm:$0xff]   ;;  %v5156_v39 = vld [vmem:[#allocation4 + $0x1b0] ss:$12 sps:$4 sm:$0xff]  }
 0x149   :  { %3073 = vmatprep.subr.bf16.mxu1 %v5128_v40  ;;  %4550 = vmatprep.subr.bf16.mxu0 %v5139_v41  ;;  %v5160_v40 = vld [vmem:[#allocation4 + $0x1b8] ss:$12 sps:$4 sm:$0xff]  }
 0x14a   :  { %v5163_v41 = vld [vmem:[#allocation4 + $0x1cc] ss:$12 sps:$4 sm:$0xff]  }
 0x14c   :  { %3074 = vmatpush1.bf16.msra.mxu1 %v5126_v42  ;;  %4551 = vmatpush3.bf16.msra.mxu0 %v5140_v43  ;;  %v5164_v42 = vld [vmem:[#allocation4 + $0x290] ss:$12 sps:$4 sm:$0xff]   ;;  %v5161_v43 = vld [vmem:[#allocation4 + $0x1c8] ss:$12 sps:$4 sm:$0xff]  }
 0x14d   :  { %3075 = vmatprep.subr.bf16.mxu1 %v5133_v44  ;;  %4552 = vmatprep.subr.bf16.mxu0 %v5144_v45  ;;  %v5165_v44 = vld [vmem:[#allocation4 + $0x1d0] ss:$12 sps:$4 sm:$0xff]  }
 0x14e   :  { %v5168_v45 = vld [vmem:[#allocation4 + $0x1e4] ss:$12 sps:$4 sm:$0xff]  }
 0x150   :  { %3076 = vmatpush1.bf16.msra.mxu1 %v5131_v46  ;;  %4553 = vmatpush3.bf16.msra.mxu0 %v5145_v47  ;;  %v5169_v46 = vld [vmem:[#allocation4 + $0x2a8] ss:$12 sps:$4 sm:$0xff]   ;;  %v5166_v47 = vld [vmem:[#allocation4 + $0x1e0] ss:$12 sps:$4 sm:$0xff]  }
 0x151   :  { %3077 = vmatprep.subr.bf16.mxu1 %v5138_v48  ;;  %4560 = vmatprep.subr.bf16.mxu0 %v5149_v49  ;;  %v5170_v48 = vld [vmem:[#allocation4 + $0x1e8] ss:$12 sps:$4 sm:$0xff]  }
 0x152   :  { %v5173_v49 = vld [vmem:[#allocation4 + $0x1fc] ss:$12 sps:$4 sm:$0xff]  }
 0x154   :  { %3078 = vmatpush1.bf16.msra.mxu1 %v5136_v50  ;;  %v5174_v50 = vld [vmem:[#allocation4 + $0x2c0] ss:$12 sps:$4 sm:$0xff]  }
 0x155   :  { %3079 = vmatprep.subr.bf16.mxu1 %v5143_v51  ;;  %v5171_v51 = vld [vmem:[#allocation4 + $0x1f8] ss:$12 sps:$4 sm:$0xff]  }
 0x158   :  { %3080 = vmatpush1.bf16.msra.mxu1 %v5141_v52  ;;  %v5175_v52 = vld [vmem:[#allocation4 + $0x200] ss:$12 sps:$4 sm:$0xff]  }
 0x159   :  { %3092 = vmatprep.subr.bf16.mxu1 %v5148_v54  ;;  %v389_v54 = vsub.s32 4, %v5549_v56 }
 0x1c6   :  { %v1872_v0 = vpop.f32.mrb[0].mxu0  ;;  %v2044_v1 = vpop.f32.mrb[0].mxu1 }
 0x1c7   :  { %v4668_v2 = vadd.f32 %v1872_v0, %v374_v62  ;;  %v4672_v3 = vadd.f32 %v2044_v1, %v382_v63  ;;  %v1874_v4 = vpop.f32.mrb[1].mxu0  ;;  %v2046_v6 = vpop.f32.mrb[1].mxu1  ;;  %v5183_v1 = vld [vmem:[#allocation4 + $0x22c] ss:$12 sps:$4 sm:$0xff]  }
 0x1c8   :  { %v4669_v7 = vadd.f32 %v1874_v4, %v378_v5  ;;  %v4673_v8 = vadd.f32 %v2046_v6, %v386_v12  ;;  %v1876_v10 = vpop.f32.mrb[2].mxu0  ;;  %v2048_v11 = vpop.f32.mrb[2].mxu1 }
 0x1c9   :  { %v4670_v13 = vadd.f32 %v1876_v10, %v374_v62  ;;  %v4674_v14 = vadd.f32 %v2048_v11, %v382_v63  ;;  %v1878_v16 = vpop.f32.mrb[3].mxu0  ;;  %v2050_v17 = vpop.f32.mrb[3].mxu1  ;;  %v2217_v20 = vmax.f32 %v4668_v2, 0.0  ;;  %v2219_v21 = vmax.f32 %v4672_v3, 0.0  ;;  %v5176_v62 = vld [vmem:[#allocation4 + $0x210] ss:$12 sps:$4 sm:$0xff]  }
 0x1ca   :  { %v4671_v18 = vadd.f32 %v1878_v16, %v378_v5  ;;  %v4675_v19 = vadd.f32 %v2050_v17, %v386_v12  ;;  %v2218_v24 = vmax.f32 %v4669_v7, 0.0  ;;  %v2220_v25 = vmax.f32 %v4673_v8, 0.0  ;;  %v5180_v63 = vld [vmem:[#allocation4 + $0x218] ss:$12 sps:$4 sm:$0xff]   ;;  %v5184_v2 = vld [vmem:[#allocation4 + $0x2f0] ss:$12 sps:$4 sm:$0xff]  }
 0x1cb   :  { %v2222_v22 = vmax.f32 %v4670_v13, 0.0  ;;  %v2224_v23 = vmax.f32 %v4674_v14, 0.0  ;;  %v390_v12 = vrot.slane %v5558_v59, %v389_v54  ;;  %v5181_v14 = vld [vmem:[#allocation4 + $0x228] ss:$12 sps:$4 sm:$0xff]   ;;  %v5185_v16 = vld [vmem:[#allocation4 + $0x230] ss:$12 sps:$4 sm:$0xff]  }
 0x1cc   :  { %v2223_v26 = vmax.f32 %v4671_v18, 0.0  ;;  %v2225_v27 = vmax.f32 %v4675_v19, 0.0  ;;  %v5188_v19 = vld [vmem:[#allocation4 + $0x244] ss:$12 sps:$4 sm:$0xff]  }
 0x1cd   :  { %v2227_v28 = vpack.c.bf16 %v2222_v22, %v2217_v20  ;;  %v5572_v29 = vpack.c.bf16 %v2224_v23, %v2219_v21  ;;  %v5186_v22 = vld [vmem:[#allocation4 + $0x240] ss:$12 sps:$4 sm:$0xff]   ;;  %v5192_v23 = vld [vmem:[#allocation4 + $0x308] ss:$12 sps:$4 sm:$0xff]  }
 0x1ce   :  { %v2228_v31 = vpack.c.bf16 %v2223_v26, %v2218_v24  ;;  %v2230_v32 = vpack.c.bf16 %v2225_v27, %v2220_v25  ;;  %v5191_v26 = vld [vmem:[#allocation4 + $0x25c] ss:$12 sps:$4 sm:$0xff]  }
 0x1d0   :  { %3081 = vmatprep.mubr.bf16.mxu1 %v2228_v31  ;;  %3210 = vmatprep.mubr.bf16.mxu0 %v2228_v31 }
 0x1d1   :  { %3082 = vmatmul.mubr.bf16.vlgmr.msra.gmra.mrb[12].mxu1 %v2227_v28  ;;  %3211 = vmatmul.mubr.bf16.vlgmr.msra.gmra.mrb[12].mxu0 %v2227_v28 }
 0x1d2   :  { %3093 = vmatpush1.bf16.msra.mxu1 %v5146_v33  ;;  %4561 = vmatpush3.bf16.msra.mxu0 %v5150_v34  ;;  %v5196_v33 = vld [vmem:[#allocation4 + $0x320] ss:$12 sps:$4 sm:$0xff]  }
 0x1d3   :  { %3124 = vmatprep.mubr.bf16.mxu1 %v2230_v32  ;;  %3251 = vmatprep.mubr.bf16.mxu0 %v2230_v32  ;;  %v5189_v32 = vld [vmem:[#allocation4 + $0x258] ss:$12 sps:$4 sm:$0xff]   ;;  %v5195_v34 = vld [vmem:[#allocation4 + $0x274] ss:$12 sps:$4 sm:$0xff]  }
 0x1d4   :  { %3094 = vmatprep.subr.bf16.mxu1 %v5153_v35  ;;  %4562 = vmatprep.subr.bf16.mxu0 %v5154_v9  ;;  %v5193_v35 = vld [vmem:[#allocation4 + $0x270] ss:$12 sps:$4 sm:$0xff]   ;;  %v5200_v9 = vld [vmem:[#allocation4 + $0x338] ss:$12 sps:$4 sm:$0xff]  }
 0x1d6   :  { %3095 = vmatpush1.bf16.msra.mxu1 %v5151_v36  ;;  %4563 = vmatpush3.bf16.msra.mxu0 %v5155_v37  ;;  %v5199_v36 = vld [vmem:[#allocation4 + $0x28c] ss:$12 sps:$4 sm:$0xff]   ;;  %v5197_v37 = vld [vmem:[#allocation4 + $0x288] ss:$12 sps:$4 sm:$0xff]  }
 0x1d7   :  { %3096 = vmatprep.subr.bf16.mxu1 %v5158_v30  ;;  %4564 = vmatprep.subr.bf16.mxu0 %v5159_v38  ;;  %v5204_v30 = vld [vmem:[#allocation4 + $0x350] ss:$12 sps:$4 sm:$0xff]  }
 0x1d8   :  { %v5203_v38 = vld [vmem:[#allocation4 + $0x2a4] ss:$12 sps:$4 sm:$0xff]  }
 0x1da   :  { %3097 = vmatpush1.bf16.msra.mxu1 %v5156_v39  ;;  %4565 = vmatpush3.bf16.msra.mxu0 %v5160_v40  ;;  %v5201_v39 = vld [vmem:[#allocation4 + $0x2a0] ss:$12 sps:$4 sm:$0xff]   ;;  %v5208_v40 = vld [vmem:[#allocation4 + $0x368] ss:$12 sps:$4 sm:$0xff]  }
 0x1db   :  { %3098 = vmatprep.subr.bf16.mxu1 %v5163_v41  ;;  %4566 = vmatprep.subr.bf16.mxu0 %v5164_v42  ;;  %v5207_v41 = vld [vmem:[#allocation4 + $0x2bc] ss:$12 sps:$4 sm:$0xff]   ;;  %v5205_v42 = vld [vmem:[#allocation4 + $0x2b8] ss:$12 sps:$4 sm:$0xff]  }
 0x1de   :  { %3099 = vmatpush1.bf16.msra.mxu1 %v5161_v43  ;;  %4567 = vmatpush3.bf16.msra.mxu0 %v5165_v44  ;;  %v5212_v43 = vld [vmem:[#allocation4 + $0x380] ss:$12 sps:$4 sm:$0xff]  }
 0x1df   :  { %3100 = vmatprep.subr.bf16.mxu1 %v5168_v45  ;;  %4568 = vmatprep.subr.bf16.mxu0 %v5169_v46  ;;  %v5211_v44 = vld [vmem:[#allocation4 + $0x2d4] ss:$12 sps:$4 sm:$0xff]   ;;  %v5209_v46 = vld [vmem:[#allocation4 + $0x2d0] ss:$12 sps:$4 sm:$0xff]  }
 0x1e2   :  { %3101 = vmatpush1.bf16.msra.mxu1 %v5166_v47  ;;  %4569 = vmatpush3.bf16.msra.mxu0 %v5170_v48  ;;  %v5216_v47 = vld [vmem:[#allocation4 + $0x398] ss:$12 sps:$4 sm:$0xff]  }
 0x1e3   :  { %3102 = vmatprep.subr.bf16.mxu1 %v5173_v49  ;;  %4570 = vmatprep.subr.bf16.mxu0 %v5174_v50  ;;  %v5215_v49 = vld [vmem:[#allocation4 + $0x2ec] ss:$12 sps:$4 sm:$0xff]  }
 0x1e6   :  { %3103 = vmatpush1.bf16.msra.mxu1 %v5171_v51  ;;  %4571 = vmatpush3.bf16.msra.mxu0 %v5175_v52  ;;  %v4486_v5 = vpop.f32.mrb[4].mxu0  ;;  %v4508_v0 = vpop.f32.mrb[4].mxu1 }
 0x1e7   :  { %3104 = vmatprep.subr.bf16.mxu1 %v5178_v55  ;;  %4572 = vmatprep.subr.bf16.mxu0 %v5179_v61  ;;  %v4487_v3 = vpop.f32.mrb[5].mxu0  ;;  %v4509_v4 = vpop.f32.mrb[5].mxu1  ;;  %v5213_v61 = vld [vmem:[#allocation4 + $0x2e8] ss:$12 sps:$4 sm:$0xff]  }
 0x1e8   :  { %v4488_v6 = vadd.f32 %v4487_v3, %v4486_v5  ;;  %v4489_v7 = vpop.f32.mrb[6].mxu0  ;;  %v4510_v8 = vadd.f32 %v4509_v4, %v4508_v0  ;;  %v4511_v10 = vpop.f32.mrb[6].mxu1  ;;  %v5223_v3 = vld [vmem:[#allocation4 + $0x31c] ss:$12 sps:$4 sm:$0xff]  }
 0x1e9   :  { %v4490_v11 = vpop.f32.mrb[7].mxu0  ;;  %v4512_v13 = vpop.f32.mrb[7].mxu1 }
 0x1ea   :  { %3105 = vmatpush1.bf16.msra.mxu1 %v5176_v62  ;;  %4573 = vmatpush3.bf16.msra.mxu0 %v5180_v63  ;;  %v2088_v17 = vadd.f32 %v4488_v6, %v390_v12  ;;  %v4491_v18 = vadd.f32 %v4490_v11, %v4489_v7  ;;  %v4513_v59 = vadd.f32 %v4512_v13, %v4511_v10  ;;  %v5220_v62 = vld [vmem:[#allocation4 + $0x3b0] ss:$12 sps:$4 sm:$0xff]   ;;  %v5221_v7 = vld [vmem:[#allocation4 + $0x318] ss:$12 sps:$4 sm:$0xff]   ;;  %v5227_v13 = vld [vmem:[#allocation4 + $0x348] ss:$12 sps:$4 sm:$0xff]  }
 0x1eb   :  { %3106 = vmatprep.subr.bf16.mxu1 %v5183_v1  ;;  %4574 = vmatprep.subr.bf16.mxu0 %v5184_v2  ;;  %v5219_v63 = vld [vmem:[#allocation4 + $0x304] ss:$12 sps:$4 sm:$0xff]   ;;  %v5217_v2 = vld [vmem:[#allocation4 + $0x300] ss:$12 sps:$4 sm:$0xff]  }
 0x1ec   :  { %v2091_v20 = vadd.f32 %v4491_v18, %v390_v12  ;;  %v5576_v21 = vadd.f32 %v4510_v8, %v2088_v17  ;;  %v5226_v8 = vld [vmem:[#allocation4 + $0x334] ss:$12 sps:$4 sm:$0xff]   ;;  %v5224_v10 = vld [vmem:[#allocation4 + $0x330] ss:$12 sps:$4 sm:$0xff]   ;;  %v5229_v11 = vld [vmem:[#allocation4 + $0x34c] ss:$12 sps:$4 sm:$0xff]  }
 0x1ed   :  { %v5233_v17 = vld [vmem:[#allocation4 + $0x378] ss:$12 sps:$4 sm:$0xff]   ;;  %v5238_v18 = vld [vmem:[#allocation4 + $0x394] ss:$12 sps:$4 sm:$0xff]  }
 0x1ee   :  { %3107 = vmatpush1.bf16.msra.mxu1 %v5181_v14  ;;  %4575 = vmatpush3.bf16.msra.mxu0 %v5185_v16  ;;  %v5578_v24 = vadd.f32 %v4513_v59, %v2091_v20  ;;  %v5580_v25 = vpop.f32.mrb[8].mxu1  ;;  %v5232_v14 = vld [vmem:[#allocation4 + $0x364] ss:$12 sps:$4 sm:$0xff]   ;;  %v5230_v16 = vld [vmem:[#allocation4 + $0x360] ss:$12 sps:$4 sm:$0xff]  }
 0x1ef   :  { %3108 = vmatprep.subr.bf16.mxu1 %v5188_v19  ;;  %4628 = vmatprep.subr.bf16.mxu0 %v5403_v53  ;;  %v4626_v27 = vpop.f32.mrb[9].mxu1  ;;  %v5236_v59 = vld [vmem:[#allocation4 + $0x390] ss:$12 sps:$4 sm:$0xff]   ;;  %v5241_v19 = vld [vmem:[#allocation4 + $0x3ac] ss:$12 sps:$4 sm:$0xff]  }
 0x1f0   :  { %v5583_v28 = vpop.f32.mrb[10].mxu1  ;;  %v5239_v20 = vld [vmem:[#allocation4 + $0x3a8] ss:$12 sps:$4 sm:$0xff]  }
 0x1f1   :  { %3252 = vmatmul.mubr.bf16.vlgmr.msra.gmra.mrb[16].mxu0 %v5572_v29  ;;  %v4627_v31 = vpop.f32.mrb[11].mxu1  ;;  %v5253_v27 = vld [vmem:[%s5857_s5 + $0x34] ss:$8 sps:$4 sm:$0xff]  }
 0x1f2   :  { %3109 = vmatpush1.bf16.msra.mxu1 %v5186_v22  ;;  %4629 = vmatpush3.bf16.msra.mxu0 %v5192_v23  ;;  %v5244_v22 = vld [vmem:[%s5857_s5 + $0x4] ss:$8 sps:$4 sm:$0xff]   ;;  %v5247_v23 = vld [vmem:[%s5857_s5 + $0x14] ss:$8 sps:$4 sm:$0xff]  }
 0x1f3   :  { %3110 = vmatprep.subr.bf16.mxu1 %v5191_v26  ;;  %4630 = vmatprep.subr.bf16.mxu0 %v5403_v53  ;;  %v5248_v26 = vld [vmem:[%s5857_s5 + $0x20] ss:$8 sps:$4 sm:$0xff]   ;;  %v5256_v31 = vld [vmem:[%s5857_s5 + $0x44] ss:$8 sps:$4 sm:$0xff]  }
 0x1f4   :  { %4644 = vmatprep.mubr.msk.bf16.mxu0 %vm5404_vm1, %v5403_v53 }
 0x1f6   :  { %3111 = vmatpush1.bf16.msra.mxu1 %v5189_v32  ;;  %4631 = vmatpush3.bf16.msra.mxu0 %v5196_v33  ;;  %v5254_v32 = vld [vmem:[%s5857_s5 + $0x40] ss:$8 sps:$4 sm:$0xff]   ;;  %v5259_v33 = vld [vmem:[%s5857_s5 + $0x54] ss:$8 sps:$4 sm:$0xff]  }
 0x1f7   :  { %3112 = vmatprep.subr.bf16.mxu1 %v5195_v34  ;;  %4632 = vmatprep.subr.bf16.mxu0 %v5403_v53  ;;  %v5257_v34 = vld [vmem:[%s5857_s5 + $0x50] ss:$8 sps:$4 sm:$0xff]  }
 0x1fa   :  { %3113 = vmatpush1.bf16.msra.mxu1 %v5193_v35  ;;  %4633 = vmatpush3.bf16.msra.mxu0 %v5200_v9  ;;  %v5262_v35 = vld [vmem:[%s5857_s5 + $0x64] ss:$8 sps:$4 sm:$0xff]   ;;  %v5260_v9 = vld [vmem:[%s5857_s5 + $0x60] ss:$8 sps:$4 sm:$0xff]  }
 0x1fb   :  { %3114 = vmatprep.subr.bf16.mxu1 %v5199_v36  ;;  %4634 = vmatprep.subr.bf16.mxu0 %v5403_v53  ;;  %v5265_v36 = vld [vmem:[%s5857_s5 + $0x74] ss:$8 sps:$4 sm:$0xff]  }
 0x1fe   :  { %3115 = vmatpush1.bf16.msra.mxu1 %v5197_v37  ;;  %4635 = vmatpush3.bf16.msra.mxu0 %v5204_v30  ;;  %v5263_v37 = vld [vmem:[%s5857_s5 + $0x70] ss:$8 sps:$4 sm:$0xff]   ;;  %v5268_v30 = vld [vmem:[%s5857_s5 + $0x84] ss:$8 sps:$4 sm:$0xff]  }
 0x1ff   :  { %3116 = vmatprep.subr.bf16.mxu1 %v5203_v38  ;;  %4636 = vmatprep.subr.bf16.mxu0 %v5403_v53  ;;  %v5266_v38 = vld [vmem:[%s5857_s5 + $0x80] ss:$8 sps:$4 sm:$0xff]  }
 0x202   :  { %3117 = vmatpush1.bf16.msra.mxu1 %v5201_v39  ;;  %4637 = vmatpush3.bf16.msra.mxu0 %v5208_v40  ;;  %v5271_v39 = vld [vmem:[%s5857_s5 + $0x94] ss:$8 sps:$4 sm:$0xff]   ;;  %v5269_v40 = vld [vmem:[%s5857_s5 + $0x90] ss:$8 sps:$4 sm:$0xff]  }
 0x203   :  { %3118 = vmatprep.subr.bf16.mxu1 %v5207_v41  ;;  %4638 = vmatprep.subr.bf16.mxu0 %v5403_v53  ;;  %v5274_v41 = vld [vmem:[%s5857_s5 + $0xa4] ss:$8 sps:$4 sm:$0xff]  }
 0x206   :  { %v4530_v45 = vpop.f32.mrb[8].mxu0  ;;  %3119 = vmatpush1.bf16.msra.mxu1 %v5205_v42  ;;  %4639 = vmatpush3.bf16.msra.mxu0 %v5212_v43  ;;  %v5272_v42 = vld [vmem:[%s5857_s5 + $0xa0] ss:$8 sps:$4 sm:$0xff]   ;;  %v5277_v43 = vld [vmem:[%s5857_s5 + $0xb4] ss:$8 sps:$4 sm:$0xff]  }
 0x207   :  { %v4531_v48 = vpop.f32.mrb[9].mxu0  ;;  %3120 = vmatprep.subr.bf16.mxu1 %v5211_v44  ;;  %4640 = vmatprep.subr.bf16.mxu0 %v5403_v53  ;;  %v5275_v44 = vld [vmem:[%s5857_s5 + $0xb0] ss:$8 sps:$4 sm:$0xff]  }
 0x208   :  { %v4532_v50 = vadd.f32 %v4531_v48, %v4530_v45  ;;  %v4533_v51 = vpop.f32.mrb[10].mxu0  ;;  %v5280_v45 = vld [vmem:[%s5857_s5 + $0xc4] ss:$8 sps:$4 sm:$0xff]   ;;  %v5281_v48 = vld [vmem:[%s5857_s5 + $0xd0] ss:$8 sps:$4 sm:$0xff]  }
 0x209   :  { %v4534_v52 = vpop.f32.mrb[11].mxu0 }
 0x20a   :  { %v4535_v54 = vadd.f32 %v4534_v52, %v4533_v51  ;;  %3121 = vmatpush1.bf16.msra.mxu1 %v5209_v46  ;;  %v2170_v55 = vadd.f32 %v4532_v50, %v5576_v21  ;;  %4641 = vmatpush3.bf16.msra.mxu0 %v5216_v47  ;;  %v5242_v21 = vld [vmem:[%s5857_s5] ss:$8 sps:$4 sm:$0xff]   ;;  %v5283_v47 = vld [vmem:[%s5857_s5 + $0xd4] ss:$8 sps:$4 sm:$0xff]   ;;  %v5287_v52 = vld [vmem:[%s5857_s5 + $0xf0] ss:$8 sps:$4 sm:$0xff]  }
 0x20b   :  { %3122 = vmatprep.subr.bf16.mxu1 %v5215_v49  ;;  %4642 = vmatprep.subr.bf16.mxu0 %v5403_v53  ;;  %v5278_v46 = vld [vmem:[%s5857_s5 + $0xc0] ss:$8 sps:$4 sm:$0xff]   ;;  %v5286_v49 = vld [vmem:[%s5857_s5 + $0xe4] ss:$8 sps:$4 sm:$0xff]   ;;  %v5289_v51 = vld [vmem:[%s5857_s5 + $0xf4] ss:$8 sps:$4 sm:$0xff]  }
 0x20c   :  { %v2211_v5 = vadd.f32 %v5580_v25, %v2170_v55  ;;  %v2173_v12 = vadd.f32 %v4535_v54, %v5578_v24  ;;  %v5245_v24 = vld [vmem:[%s5857_s5 + $0x10] ss:$8 sps:$4 sm:$0xff]   ;;  %v5250_v25 = vld [vmem:[%s5857_s5 + $0x24] ss:$8 sps:$4 sm:$0xff]   ;;  %v5284_v50 = vld [vmem:[%s5857_s5 + $0xe0] ss:$8 sps:$4 sm:$0xff]  }
 0x20d   :  { %v5292_v54 = vld [vmem:[%s5857_s5 + $0x104] ss:$8 sps:$4 sm:$0xff]  }
 0x20e   :  { %v2221_v0 = vmax.f32 %v2211_v5, 0.0  ;;  %v2214_v1 = vadd.f32 %v5583_v28, %v2173_v12  ;;  %3123 = vmatpush1.bf16.msra.mxu1 %v5213_v61  ;;  %4643 = vmatpush3.bf16.msra.mxu0 %v5220_v62  ;;  %v5251_v28 = vld [vmem:[%s5857_s5 + $0x30] ss:$8 sps:$4 sm:$0xff]  }
 0x20f   :  { %3135 = vmatprep.subr.bf16.mxu1 %v5219_v63  ;;  %3610 = vmatprep.subr.bf16.mxu0 %v5244_v22 }
 0x210   :  { %v2226_v4 = vmax.f32 %v2214_v1, 0.0  ;;  %v5315_v1 = vld [vmem:[%s5859_s7] sm:$0xff]  }
 0x211   :  { %3125 = vmatmul.mubr.bf16.vlgmr.msra.gmra.mrb[12].mxu1 %v5572_v29  ;;  %v5235_v29 = vld [vmem:[#allocation4 + $0x37c] ss:$12 sps:$4 sm:$0xff]  }
 0x212   :  { %v2231_v6 = vpack.c.bf16 %v2226_v4, %v2221_v0  ;;  %3136 = vmatpush1.bf16.msra.mxu1 %v5217_v2  ;;  %3167 = vmatprep.mubr.bf16.mxu1 %v5402_v15  ;;  %v5314_v0 = vld [vmem:[%s5859_s7 + $0x40] sm:$0xff]   ;;  %v5316_v2 = vld [vmem:[%s5859_s7 + $0x48] sm:$0xff]   ;;  %v5318_v4 = vld [vmem:[%s5859_s7 + $0x50] sm:$0xff]  }
 0x213   :  { %3137 = vmatprep.subr.bf16.mxu1 %v5223_v3  ;;  %v5317_v3 = vld [vmem:[%s5859_s7 + $0x8] sm:$0xff]  }
 0x214   :  { %4645 = vmatmul.mubr.bf16.vlgmr.msra.gmra.mrb[20].mxu0 %v2231_v6 }
 0x215   :  { %3611 = vmatpush1.bf16.msra.mxu0 %v5242_v21 }
 0x216   :  { %3138 = vmatpush1.bf16.msra.mxu1 %v5221_v7  ;;  %3612 = vmatprep.subr.bf16.mxu0 %v5247_v23  ;;  %v5320_v7 = vld [vmem:[%s5859_s7 + $0x58] sm:$0xff]  }
 0x217   :  { %3139 = vmatprep.subr.bf16.mxu1 %v5226_v8  ;;  %v5321_v8 = vld [vmem:[%s5859_s7 + $0x18] sm:$0xff]  }
 0x219   :  { %3613 = vmatpush1.bf16.msra.mxu0 %v5245_v24 }
 0x21a   :  { %3140 = vmatpush1.bf16.msra.mxu1 %v5224_v10  ;;  %3614 = vmatprep.subr.bf16.mxu0 %v5250_v25  ;;  %v5322_v10 = vld [vmem:[%s5859_s7 + $0x60] sm:$0xff]  }
 0x21b   :  { %3141 = vmatprep.subr.bf16.mxu1 %v5229_v11  ;;  %v5323_v11 = vld [vmem:[%s5859_s7 + $0x20] sm:$0xff]  }
 0x21d   :  { %3615 = vmatpush1.bf16.msra.mxu0 %v5248_v26 }
 0x21e   :  { %3142 = vmatpush1.bf16.msra.mxu1 %v5227_v13  ;;  %3616 = vmatprep.subr.bf16.mxu0 %v5253_v27  ;;  %v2392_v13 = vld [vmem:[%s5856_s4] sm:$0x7] }
 0x21f   :  { %3143 = vmatprep.subr.bf16.mxu1 %v5232_v14  ;;  %v5324_v14 = vld [vmem:[%s5859_s7 + $0x68] sm:$0xff]  }
 0x221   :  { %3617 = vmatpush1.bf16.msra.mxu0 %v5251_v28 }
 0x222   :  { %3144 = vmatpush1.bf16.msra.mxu1 %v5230_v16  ;;  %3618 = vmatprep.subr.bf16.mxu0 %v5256_v31  ;;  %v2405_v16 = vrot.slane %v2392_v13, %v381_v58 }
 0x223   :  { %3145 = vmatprep.subr.bf16.mxu1 %v5235_v29 }
 0x225   :  { %3619 = vmatpush1.bf16.msra.mxu0 %v5254_v32 }
 0x226   :  { %3146 = vmatpush1.bf16.msra.mxu1 %v5233_v17  ;;  %3620 = vmatprep.subr.bf16.mxu0 %v5259_v33 }
 0x227   :  { %3147 = vmatprep.subr.bf16.mxu1 %v5238_v18 }
 0x229   :  { %3621 = vmatpush1.bf16.msra.mxu0 %v5257_v34  ;;  %v2397_v34 = vrot.slane %v2392_v13, %v5552_v57 }
 0x22a   :  { %3148 = vmatpush1.bf16.msra.mxu1 %v5236_v59  ;;  %3622 = vmatprep.subr.bf16.mxu0 %v5262_v35  ;;  %v2401_v35 = vrot.slane %v2392_v13, %v5561_v60 }
 0x22b   :  { %3149 = vmatprep.subr.bf16.mxu1 %v5241_v19 }
 0x22d   :  { %3623 = vmatpush1.bf16.msra.mxu0 %v5260_v9 }
 0x22e   :  { %3150 = vmatpush1.bf16.msra.mxu1 %v5239_v20  ;;  %3624 = vmatprep.subr.bf16.mxu0 %v5265_v36 }
 0x22f   :  { %4591 = vmatprep.subr.bf16.mxu1 %v5314_v0  ;;  %v5313_v0 = vld [vmem:[%s5857_s5 + $0x174] ss:$8 sps:$4 sm:$0xff]  }
 0x231   :  { %3168 = vmatmul.mubr.bf16.vlgmr.msra.gmra.mrb[12].mxu1 %v2231_v6  ;;  %3625 = vmatpush1.bf16.msra.mxu0 %v5263_v37  ;;  %v5319_v6 = vld [vmem:[%s5859_s7 + $0x10] sm:$0xff]  }
 0x232   :  { %3626 = vmatprep.subr.bf16.mxu0 %v5268_v30  ;;  %4592 = vmatpush3.bf16.msra.mxu1 %v5315_v1  ;;  %v5311_v1 = vld [vmem:[%s5857_s5 + $0x170] ss:$8 sps:$4 sm:$0xff]  }
 0x233   :  { %4593 = vmatprep.subr.bf16.mxu1 %v5316_v2  ;;  %v5325_v2 = vld [vmem:[%s5859_s7 + $0x28] sm:$0xff]  }
 0x235   :  { %3627 = vmatpush1.bf16.msra.mxu0 %v5266_v38 }
 0x236   :  { %3628 = vmatprep.subr.bf16.mxu0 %v5271_v39  ;;  %4594 = vmatpush3.bf16.msra.mxu1 %v5317_v3  ;;  %v5326_v3 = vld [vmem:[%s5859_s7 + $0x70] sm:$0xff]  }
 0x237   :  { %4595 = vmatprep.subr.bf16.mxu1 %v5318_v4  ;;  %v5327_v4 = vld [vmem:[%s5859_s7 + $0x30] sm:$0xff]  }
 0x239   :  { %3629 = vmatpush1.bf16.msra.mxu0 %v5269_v40 }
 0x23a   :  { %3630 = vmatprep.subr.bf16.mxu0 %v5274_v41  ;;  %4596 = vmatpush3.bf16.msra.mxu1 %v5319_v6  ;;  %v5328_v6 = vld [vmem:[%s5859_s7 + $0x78] sm:$0xff]  }
 0x23b   :  { %4597 = vmatprep.subr.bf16.mxu1 %v5320_v7  ;;  %v5329_v7 = vld [vmem:[%s5859_s7 + $0x38] sm:$0xff]  }
 0x23d   :  { %3631 = vmatpush1.bf16.msra.mxu0 %v5272_v42 }
 0x23e   :  { %3632 = vmatprep.subr.bf16.mxu0 %v5277_v43  ;;  %4598 = vmatpush3.bf16.msra.mxu1 %v5321_v8  ;;  %v3358_v8 = vld [vmem:[%s5858_s6] sm:$0x3] }
 0x23f   :  { %4599 = vmatprep.subr.bf16.mxu1 %v5322_v10  ;;  %v3363_v10 = vrot.slane %v3358_v8, %v5552_v57  ;;  %v5330_v57 = vld [vmem:[%s5861_s9] sm:$0xff]  }
 0x241   :  { %3633 = vmatpush1.bf16.msra.mxu0 %v5275_v44 }
 0x242   :  { %3634 = vmatprep.subr.bf16.mxu0 %v5280_v45  ;;  %4600 = vmatpush3.bf16.msra.mxu1 %v5323_v11  ;;  %v3367_v11 = vrot.slane %v3358_v8, %v5561_v60  ;;  %v5331_v60 = vld [vmem:[%s5861_s9 + $0x8] sm:$0xff]  }
 0x243   :  { %4601 = vmatprep.subr.bf16.mxu1 %v5324_v14 }
 0x245   :  { %3635 = vmatpush1.bf16.msra.mxu0 %v5278_v46 }
 0x246   :  { %3636 = vmatprep.subr.bf16.mxu0 %v5283_v47  ;;  %4602 = vmatpush3.bf16.msra.mxu1 %v5325_v2 }
 0x247   :  { %4603 = vmatprep.subr.bf16.mxu1 %v5326_v3 }
 0x249   :  { %3637 = vmatpush1.bf16.msra.mxu0 %v5281_v48  ;;  %v5290_v48 = vld [vmem:[%s5857_s5 + $0x100] ss:$8 sps:$4 sm:$0xff]  }
 0x24a   :  { %3638 = vmatprep.subr.bf16.mxu0 %v5286_v49  ;;  %v5295_v49 = vld [vmem:[%s5857_s5 + $0x114] ss:$8 sps:$4 sm:$0xff]   ;;  %4604 = vmatpush3.bf16.msra.mxu1 %v5327_v4 }
 0x24b   :  { %4605 = vmatprep.subr.bf16.mxu1 %v5328_v6 }
 0x24d   :  { %3639 = vmatpush1.bf16.msra.mxu0 %v5284_v50  ;;  %v5293_v50 = vld [vmem:[%s5857_s5 + $0x110] ss:$8 sps:$4 sm:$0xff]  }
 0x24e   :  { %3640 = vmatprep.subr.bf16.mxu0 %v5289_v51  ;;  %v5298_v51 = vld [vmem:[%s5857_s5 + $0x124] ss:$8 sps:$4 sm:$0xff]   ;;  %4606 = vmatpush3.bf16.msra.mxu1 %v5329_v7 }
 0x24f   :  { %4648 = vmatprep.subr.bf16.mxu1 %v5403_v53 }
 0x251   :  { %3641 = vmatpush1.bf16.msra.mxu0 %v5287_v52  ;;  %v5296_v52 = vld [vmem:[%s5857_s5 + $0x120] ss:$8 sps:$4 sm:$0xff]  }
 0x252   :  { %3653 = vmatprep.subr.bf16.mxu0 %v5292_v54  ;;  %v5301_v54 = vld [vmem:[%s5857_s5 + $0x134] ss:$8 sps:$4 sm:$0xff]  }
 0x2a4   :  { %v4554_v55 = vpop.f32.mrb[12].mxu0 }
 0x2a5   :  { %v4555_v61 = vpop.f32.mrb[13].mxu0 }
 0x2a6   :  { %v4556_v62 = vadd.f32 %v4555_v61, %v4554_v55  ;;  %v4557_v63 = vpop.f32.mrb[14].mxu0  ;;  %v5304_v55 = vld [vmem:[%s5857_s5 + $0x144] ss:$8 sps:$4 sm:$0xff]   ;;  %v5302_v61 = vld [vmem:[%s5857_s5 + $0x140] ss:$8 sps:$4 sm:$0xff]  }
 0x2a7   :  { %v4558_v5 = vpop.f32.mrb[15].mxu0 }
 0x2a8   :  { %v4559_v12 = vadd.f32 %v4558_v5, %v4557_v63  ;;  %v3213_v18 = vadd.f32 %v4556_v62, %v2405_v16  ;;  %v5307_v62 = vld [vmem:[%s5857_s5 + $0x154] ss:$8 sps:$4 sm:$0xff]   ;;  %v5305_v63 = vld [vmem:[%s5857_s5 + $0x150] ss:$8 sps:$4 sm:$0xff]   ;;  %v5310_v5 = vld [vmem:[%s5857_s5 + $0x164] ss:$8 sps:$4 sm:$0xff]  }
 0x2aa   :  { %v3216_v21 = vadd.f32 %v4559_v12, %v2405_v16  ;;  %v5308_v12 = vld [vmem:[%s5857_s5 + $0x160] ss:$8 sps:$4 sm:$0xff]  }
 0x2c4   :  { %v4576_v29 = vpop.f32.mrb[16].mxu0 }
 0x2c5   :  { %v4577_v17 = vpop.f32.mrb[17].mxu0 }
 0x2c6   :  { %v4578_v59 = vadd.f32 %v4577_v17, %v4576_v29  ;;  %v4579_v19 = vpop.f32.mrb[18].mxu0 }
 0x2c7   :  { %v4580_v20 = vpop.f32.mrb[19].mxu0 }
 0x2c8   :  { %v4581_v22 = vadd.f32 %v4580_v20, %v4579_v19  ;;  %v3254_v23 = vadd.f32 %v4578_v59, %v3213_v18 }
 0x2ca   :  { %v3257_v24 = vadd.f32 %v4581_v22, %v3216_v21 }
 0x2e7   :  { %v3294_v25 = vpop.f32.mrb[20].mxu0 }
 0x2e8   :  { %v3295_v26 = vadd.f32 %v3294_v25, %v3254_v23  ;;  %v4646_v27 = vpop.f32.mrb[21].mxu0 }
 0x2e9   :  { %v3297_v28 = vpop.f32.mrb[22].mxu0  ;;  %v5333_v27 = vld [vmem:[%s5861_s9 + $0x18] sm:$0xff]  }
 0x2ea   :  { %v3298_v31 = vadd.f32 %v3297_v28, %v3257_v24  ;;  %v4647_v32 = vpop.f32.mrb[23].mxu0  ;;  %v3303_v56 = vmax.f32 %v3295_v26, 0.0  ;;  %v5332_v26 = vld [vmem:[%s5861_s9 + $0x10] sm:$0xff]   ;;  %v5334_v28 = vld [vmem:[%s5861_s9 + $0x20] sm:$0xff]  }
 0x2eb   :  { %v5336_v32 = vld [vmem:[%s5861_s9 + $0x30] sm:$0xff]  }
 0x2ec   :  { %v3306_v58 = vmax.f32 %v3298_v31, 0.0  ;;  %v5335_v31 = vld [vmem:[%s5861_s9 + $0x28] sm:$0xff]  }
 0x2ee   :  { %v3309_v33 = vpack.c.bf16 %v3306_v58, %v3303_v56  ;;  %v5337_v56 = vld [vmem:[%s5861_s9 + $0x38] sm:$0xff]  }
 0x304   :  { %v3169_v9 = vpop.f32.mrb[12].mxu1 }
 0x305   :  { %v4676_v36 = vadd.f32 %v3169_v9, %v2397_v34  ;;  %v3171_v37 = vpop.f32.mrb[13].mxu1 }
 0x306   :  { %v4677_v30 = vadd.f32 %v3171_v37, %v2401_v35  ;;  %v3173_v38 = vpop.f32.mrb[14].mxu1 }
 0x307   :  { %v4678_v39 = vadd.f32 %v3173_v38, %v2397_v34  ;;  %v3175_v40 = vpop.f32.mrb[15].mxu1  ;;  %v3301_v42 = vmax.f32 %v4676_v36, 0.0 }
 0x308   :  { %v4679_v41 = vadd.f32 %v3175_v40, %v2401_v35  ;;  %v3302_v44 = vmax.f32 %v4677_v30, 0.0 }
 0x309   :  { %v3304_v43 = vmax.f32 %v4678_v39, 0.0 }
 0x30a   :  { %v3305_v45 = vmax.f32 %v4679_v41, 0.0  ;;  %v4461_v41 = vld [vmem:[%s5862_s10] ss:$0 sm:$0xff] }
 0x30b   :  { %v3307_v46 = vpack.c.bf16 %v3304_v43, %v3301_v42 }
 0x30c   :  { %v3308_v47 = vpack.c.bf16 %v3305_v45, %v3302_v44 }
 0x30e   :  { %3642 = vmatprep.mubr.bf16.mxu0 %v3308_v47 }
 0x30f   :  { %3643 = vmatmul.mubr.bf16.vlgmr.msra.gmra.mrb[24].mxu0 %v3307_v46 }
 0x310   :  { %3654 = vmatpush1.bf16.msra.mxu0 %v5290_v48  ;;  %3685 = vmatprep.mubr.bf16.mxu0 %v5402_v15  ;;  %v5299_v15 = vld [vmem:[%s5857_s5 + $0x130] ss:$8 sps:$4 sm:$0xff]  }
 0x311   :  { %3655 = vmatprep.subr.bf16.mxu0 %v5295_v49 }
 0x314   :  { %3656 = vmatpush1.bf16.msra.mxu0 %v5293_v50 }
 0x315   :  { %3657 = vmatprep.subr.bf16.mxu0 %v5298_v51 }
 0x318   :  { %3658 = vmatpush1.bf16.msra.mxu0 %v5296_v52 }
 0x319   :  { %3659 = vmatprep.subr.bf16.mxu0 %v5301_v54 }
 0x31c   :  { %3660 = vmatpush1.bf16.msra.mxu0 %v5299_v15 }
 0x31d   :  { %3661 = vmatprep.subr.bf16.mxu0 %v5304_v55 }
 0x320   :  { %3662 = vmatpush1.bf16.msra.mxu0 %v5302_v61 }
 0x321   :  { %3663 = vmatprep.subr.bf16.mxu0 %v5307_v62 }
 0x324   :  { %3664 = vmatpush1.bf16.msra.mxu0 %v5305_v63 }
 0x325   :  { %3665 = vmatprep.subr.bf16.mxu0 %v5310_v5 }
 0x328   :  { %3666 = vmatpush1.bf16.msra.mxu0 %v5308_v12 }
 0x329   :  { %3667 = vmatprep.subr.bf16.mxu0 %v5313_v0 }
 0x32c   :  { %3668 = vmatpush1.bf16.msra.mxu0 %v5311_v1 }
 0x32f   :  { %3686 = vmatmul.mubr.bf16.vlgmr.msra.gmra.mrb[24].mxu0 %v3309_v33  ;;  %v4444_v33 = vld [vmem:[%s5860_s8] ss:$0 sm:$0xff] }
 0x402   :  { %v3687_v13 = vpop.f32.mrb[24].mxu0 }
 0x403   :  { %v4680_v14 = vadd.f32 %v3687_v13, %v3363_v10  ;;  %v3689_v16 = vpop.f32.mrb[25].mxu0 }
 0x404   :  { %v4681_v29 = vadd.f32 %v3689_v16, %v3367_v11  ;;  %v3691_v17 = vpop.f32.mrb[26].mxu0 }
 0x405   :  { %v4682_v18 = vadd.f32 %v3691_v17, %v3363_v10  ;;  %v3693_v59 = vpop.f32.mrb[27].mxu0  ;;  %v3696_v20 = vmax.f32 %v4680_v14, 0.0 }
 0x406   :  { %v4683_v19 = vadd.f32 %v3693_v59, %v3367_v11  ;;  %v3697_v22 = vmax.f32 %v4681_v29, 0.0 }
 0x407   :  { %v3698_v21 = vmax.f32 %v4682_v18, 0.0 }
 0x408   :  { %v3699_v23 = vmax.f32 %v4683_v19, 0.0 }
 0x409   :  { %v3700_v24 = vpack.c.bf16 %v3698_v21, %v3696_v20 }
 0x40a   :  { %v3701_v25 = vpack.c.bf16 %v3699_v23, %v3697_v22 }
 0x40c   :  { %3869 = vmatprep.mubr.bf16.mxu1 %v3701_v25 }
 0x40d   :  { %3870 = vmatmul.mubr.bf16.vlgmr.msra.gmra.mrb[16].mxu1 %v3700_v24 }
 0x40e   :  { %4649 = vmatpush3.bf16.msra.mxu1 %v5330_v57  ;;  %4664 = vmatprep.mubr.msk.bf16.mxu1 %vm5404_vm1, %v5403_v53 }
 0x40f   :  { %4650 = vmatprep.subr.bf16.mxu1 %v5403_v53 }
 0x412   :  { %4651 = vmatpush3.bf16.msra.mxu1 %v5331_v60 }
 0x413   :  { %4652 = vmatprep.subr.bf16.mxu1 %v5403_v53 }
 0x416   :  { %4653 = vmatpush3.bf16.msra.mxu1 %v5332_v26 }
 0x417   :  { %4654 = vmatprep.subr.bf16.mxu1 %v5403_v53 }
 0x41a   :  { %4655 = vmatpush3.bf16.msra.mxu1 %v5333_v27 }
 0x41b   :  { %4656 = vmatprep.subr.bf16.mxu1 %v5403_v53 }
 0x41e   :  { %4657 = vmatpush3.bf16.msra.mxu1 %v5334_v28 }
 0x41f   :  { %4658 = vmatprep.subr.bf16.mxu1 %v5403_v53 }
 0x422   :  { %4659 = vmatpush3.bf16.msra.mxu1 %v5335_v31 }
 0x423   :  { %4660 = vmatprep.subr.bf16.mxu1 %v5403_v53 }
 0x426   :  { %4661 = vmatpush3.bf16.msra.mxu1 %v5336_v32 }
 0x427   :  { %4662 = vmatprep.subr.bf16.mxu1 %v5403_v53 }
 0x42a   :  { %4663 = vmatpush3.bf16.msra.mxu1 %v5337_v56 }
 0x4e0   :  { %v4607_v58 = vpop.f32.mrb[16].mxu1 }
 0x4e1   :  { %v4608_v34 = vpop.f32.mrb[17].mxu1 }
 0x4e2   :  { %v4609_v35 = vadd.f32 %v4608_v34, %v4607_v58  ;;  %v4610_v9 = vpop.f32.mrb[18].mxu1 }
 0x4e3   :  { %v4611_v36 = vpop.f32.mrb[19].mxu1 }
 0x4e4   :  { %v3872_v37 = vadd.f32 %v4609_v35, %v4444_v33  ;;  %v4612_v30 = vadd.f32 %v4611_v36, %v4610_v9 }
 0x4e6   :  { %v3875_v38 = vadd.f32 %v4612_v30, %v4444_v33  ;;  %v3878_v39 = vmax.f32 %v3872_v37, 0.0 }
 0x4e8   :  { %v3879_v40 = vmax.f32 %v3875_v38, 0.0 }
 0x4ea   :  { %v3880_v53 = vpack.c.bf16 %v3879_v40, %v3878_v39 }
 0x4ec   :  { %4665 = vmatmul.mubr.bf16.vlgmr.msra.gmra.mrb[20].mxu1 %v3880_v53 }
 0x5bf   :  { %v3986_v42 = vpop.f32.mrb[20].mxu1 }
 0x5c0   :  { %v3987_v43 = vadd.f32 %v4461_v41, %v3986_v42  ;;  %v4666_v44 = vpop.f32.mrb[21].mxu1 }
 0x5c1   :  { %v3989_v45 = vpop.f32.mrb[22].mxu1 }
 0x5c2   :  { %3993 = vmax.xlane.f32.xlu0 %v3987_v43  ;;  %v4667_v46 = vpop.f32.mrb[23].mxu1  ;;  %v3990_v47 = vadd.f32 %v4461_v41, %v3989_v45 }
 0x5c6   :  { %3995 = vmax.xlane.f32.xlu0 %v3990_v47 }
 0x64f   :  { %v3994_v48 = vpop.xlane.xlu0 %3993 }
 0x650   :  { %v3997_v49 = vsub.f32 %v3987_v43, %v3994_v48 }
 0x652   :  { %v3999_v50 = vmul.f32 1.442695, %v3997_v49 }
 0x653   :  { %v3996_v51 = vpop.xlane.xlu0 %3995 }
 0x654   :  { %v3998_v52 = vsub.f32 %v3990_v47, %v3996_v51  ;;  %5338 = vpow2.f32 %v3999_v50 }
 0x656   :  { %v4001_v54 = vmul.f32 1.442695, %v3998_v52 }
 0x658   :  { %5340 = vpow2.f32 %v4001_v54 }
 0x65e   :  { %v5339_v15 = vpop.eup %5338 }
 0x65f   :  { %4003 = vadd.xlane.f32.xlu1 %v5339_v15 }
 0x662   :  { %v5341_v55 = vpop.eup %5340 }
 0x663   :  { %4005 = vadd.xlane.f32.xlu1 %v5341_v55 }
 0x6ec   :  { %v4004_v61 = vpop.xlane.xlu1 %4003 }
 0x6ed   :  { %5342 = vlog2.f32 %v4004_v61 }
 0x6f0   :  { %v4006_v62 = vpop.xlane.xlu1 %4005 }
 0x6f1   :  { %5344 = vlog2.f32 %v4006_v62 }
 0x6f7   :  { %v5343_v63 = vpop.eup %5342 }
 0x6f8   :  { %v4008_v5 = vmul.f32 0.6931472, %v5343_v63 }
 0x6fa   :  { %v4011_v12 = vsub.f32 %v3997_v49, %v4008_v5 }
 0x6fb   :  { %v5345_v0 = vpop.eup %5344 }
 0x6fc   :  { %4013 = vst [vmem:[%s5863_s11] sm:$0xff] %v4011_v12  ;;  %v4010_v1 = vmul.f32 0.6931472, %v5345_v0 }
 0x6fe   :  { %v4012_v2 = vsub.f32 %v3998_v52, %v4010_v1 }
 0x700   :  { %4014 = vst [vmem:[%s5863_s11 + $0x8] sm:$0xff] %v4012_v2 }
 0x701   :  { %4019 = vsyncpa [#allocation3], 1 }
 0x702   :  { %4020 = vsyncpa [#allocation5], 1 }

</bundles_post_ra>
